<compile_context>
chip_gen: v7x
topology: tpu7x:2x2x1
jax: 0.10.0
libtpu: 0.0.40
codegen_flags: <defaults>
</compile_context>

<pallas_src>
import math

import jax
import jax.numpy as jnp
import numpy as np
from jax.experimental import pallas as pl
from jax.experimental.pallas import tpu as pltpu


# ----------------------------- shared math helpers -----------------------------
def _layer_norm(v, g, b, eps=1e-5):
    mu = jnp.mean(v, axis=-1, keepdims=True)
    var = jnp.mean((v - mu) ** 2, axis=-1, keepdims=True)
    return (v - mu) * jax.lax.rsqrt(var + eps) * g + b


def _up(x, m):
    return ((x + m - 1) // m) * m


# ------------------------------ static slab layout ------------------------------
# per-layer bias-slab row indices (each piece starts at lane 0 of its own row)
R_BQKV, R_BO, R_BFF1, R_BFF2, R_G1, R_BE1, R_G2, R_BE2 = range(8)


def make_layout(B, S, F, D, H, FF, L):
    """Static row/lane offsets shared by the packer and the kernel."""
    M = B * S
    lay = {}
    # ---- misc slab rows (lanes padded to 128; matmul operands 8-row aligned) ----
    lay['PE0'] = 0                                  # (M, D)     pe @ fc1^T (batch-tiled)
    lay['WFC10'] = _up(lay['PE0'] + M, 8)           # (F, D)     sqrt(F) * fc1^T
    lay['FC20'] = _up(lay['WFC10'] + F, 8)          # (D, D//2)  fc2^T
    lay['SC0'] = _up(lay['FC20'] + D, 8)            # (D//2,128) score^T lane-padded
    lay['GF0'] = lay['SC0'] + D // 2                # (1, D)     final LN gamma
    lay['BF0'] = lay['GF0'] + 1                     # (1, D)     final LN beta
    lay['BIAS0'] = lay['BF0'] + 1                   # 8 rows per layer, lane-0 aligned
    lay['ROWS'] = _up(lay['BIAS0'] + 8 * L, 8)
    # ---- weight slab lanes: one 128-lane column block per operand ----
    lay['C_QKV'] = 0
    lay['C_OUT'] = _up(3 * D, 128)
    lay['C_FF1'] = lay['C_OUT'] + _up(D, 128)
    lay['C_FF2'] = lay['C_FF1'] + _up(FF, 128)
    lay['WCOLS'] = lay['C_FF2'] + _up(D, 128)
    lay['WROWS'] = _up(max(D, FF), 8)
    return lay


# --------------------------------- Pallas kernel --------------------------------
def make_trans_kernel(B, S, F, D, H, FF, L, lay):
    dh = D // H
    M = B * S
    f32 = jnp.float32

    PE0, WFC10, FC20, SC0 = lay['PE0'], lay['WFC10'], lay['FC20'], lay['SC0']
    GF0, BF0, BIAS0 = lay['GF0'], lay['BF0'], lay['BIAS0']
    C_QKV, C_OUT, C_FF1, C_FF2 = lay['C_QKV'], lay['C_OUT'], lay['C_FF1'], lay['C_FF2']

    def kernel(x_ref, misc_ref, w_ref, out_ref, attn_sc):
        # fc1 + relu on the flattened (B*S, F) token slab; sqrt(d_model) scale and
        # positional encoding are pre-folded through fc1 in the packer.
        pe_fc1 = misc_ref[PE0:PE0 + M, 0:D]                                        # (M, D)
        wfc1 = misc_ref[WFC10:WFC10 + F, 0:D]                                      # (F, D)
        h = jnp.maximum(
            jnp.dot(x_ref[...], wfc1, preferred_element_type=f32) + pe_fc1, 0.0)   # (M, D)

        for l in range(L):                           # post-norm encoder layers
            br = BIAS0 + 8 * l

            # ---- fused QKV projection (1/sqrt(dh) pre-folded into the q columns) ----
            wqkv = w_ref[l, 0:D, C_QKV:C_QKV + 3 * D]                              # (D, 3D)
            b_qkv = misc_ref[br + R_BQKV:br + R_BQKV + 1, 0:3 * D]                 # (1, 3D)
            qkv = jnp.dot(h, wqkv, preferred_element_type=f32) + b_qkv             # (M, 3D)

            # ---- attention batched over all B*H heads ----
            q = jnp.stack([qkv[b * S:(b + 1) * S, hh * dh:(hh + 1) * dh]
                           for b in range(B) for hh in range(H)])                  # (BH, S, dh)
            k = jnp.stack([qkv[b * S:(b + 1) * S, D + hh * dh:D + (hh + 1) * dh]
                           for b in range(B) for hh in range(H)])
            v = jnp.stack([qkv[b * S:(b + 1) * S, 2 * D + hh * dh:2 * D + (hh + 1) * dh]
                           for b in range(B) for hh in range(H)])

            s = jax.lax.dot_general(q, k, (((2,), (2,)), ((0,), (0,))),
                                    preferred_element_type=f32)                    # (BH, S, S)
            m = jnp.max(s, axis=-1, keepdims=True)
            e = jnp.exp(s - m)
            p = e * pl.reciprocal(jnp.sum(e, axis=-1, keepdims=True), approx=True)
            o = jax.lax.dot_general(p, v, (((2,), (1,)), ((0,), (0,))),
                                    preferred_element_type=f32)                    # (BH, S, dh)

            # recombine heads into (M, D) via VMEM scratch stores at static lane
            # offsets (store slot) instead of XLU lane/sublane concatenates.
            for b in range(B):
                for hh in range(H):
                    attn_sc[b * S:(b + 1) * S, hh * dh:(hh + 1) * dh] = o[b * H + hh]
            attn = attn_sc[...]                                                    # (M, D)

            # ---- fused out-projection + residual + LayerNorm1 ----
            wo = w_ref[l, 0:D, C_OUT:C_OUT + D]                                    # (D, D)
            b_o = misc_ref[br + R_BO:br + R_BO + 1, 0:D]
            attn = jnp.dot(attn, wo, preferred_element_type=f32) + b_o
            h = _layer_norm(h + attn,
                            misc_ref[br + R_G1:br + R_G1 + 1, 0:D],
                            misc_ref[br + R_BE1:br + R_BE1 + 1, 0:D])

            # ---- feed-forward + residual + LayerNorm2 ----
            wff1 = w_ref[l, 0:D, C_FF1:C_FF1 + FF]                                 # (D, FF)
            b_ff1 = misc_ref[br + R_BFF1:br + R_BFF1 + 1, 0:FF]
            ff = jnp.maximum(jnp.dot(h, wff1, preferred_element_type=f32) + b_ff1, 0.0)
            wff2 = w_ref[l, 0:FF, C_FF2:C_FF2 + D]                                 # (FF, D)
            b_ff2 = misc_ref[br + R_BFF2:br + R_BFF2 + 1, 0:D]
            ff = jnp.dot(ff, wff2, preferred_element_type=f32) + b_ff2
            h = _layer_norm(h + ff,
                            misc_ref[br + R_G2:br + R_G2 + 1, 0:D],
                            misc_ref[br + R_BE2:br + R_BE2 + 1, 0:D])

        # last timestep per batch, then final encoder LayerNorm (LN is row-wise,
        # so taking the last row first is equivalent to the reference ordering).
        last = jnp.concatenate(
            [h[b * S + S - 1:b * S + S, :] for b in range(B)], axis=0)             # (B, D)
        last = _layer_norm(last, misc_ref[GF0:GF0 + 1, 0:D], misc_ref[BF0:BF0 + 1, 0:D])

        # relu(fc2) + score_layer; score weight is lane-padded to 128 so the final
        # store is a lane-dense (B, 128) block (real score is column 0).
        z = jnp.maximum(
            jnp.dot(last, misc_ref[FC20:FC20 + D, 0:D // 2],
                    preferred_element_type=f32), 0.0)                              # (B, D//2)
        out_ref[...] = jnp.dot(z, misc_ref[SC0:SC0 + D // 2, :],
                               preferred_element_type=f32)                         # (B, 128)

    return kernel


def trans_forward(x, kp):
    d = kp['dims']
    B, S, F, D = d['B'], d['S'], d['F'], d['D']
    kernel = make_trans_kernel(B, S, F, D, d['H'], d['FF'], d['L'], kp['layout'])
    vmem = pl.BlockSpec(memory_space=pltpu.MemorySpace.VMEM)
    out = pl.pallas_call(
        kernel,
        out_shape=jax.ShapeDtypeStruct((B, 128), jnp.float32),
        in_specs=[vmem, vmem, vmem],
        out_specs=vmem,
        scratch_shapes=[pltpu.VMEM((B * S, D), jnp.float32)],
    )(x.reshape(B * S, F), kp['misc_slab'], kp['w_slab'])
    return out[:, 0:1]


# ------------------------- parameter construction (synthetic) -------------------------
def positional_encoding(max_seq_len, d_model):
    # exact reproduction of the PyTorch loop (incl. the i-1 == -1 wraparound)
    pe = np.zeros((max_seq_len, d_model), np.float32)
    for pos in range(max_seq_len):
        for i in range(0, d_model, 2):
            pe[pos, i - 1] = math.sin(pos / 10000 ** (2 * i / d_model))
            pe[pos, i] = math.cos(pos / 10000 ** (2 * (i + 1) / d_model))
    return jnp.asarray(pe)


def init_torch_style_params(key, input_size, dim_model, dim_ff, seq_len, num_layers):
    D = dim_model
    keys = iter(jax.random.split(key, 16 + 12 * num_layers))

    def w(shape, fan_in):
        return jax.random.normal(next(keys), shape, jnp.float32) / math.sqrt(fan_in)

    def g(shape):
        return 1.0 + 0.05 * jax.random.normal(next(keys), shape, jnp.float32)

    def b(shape):
        return 0.05 * jax.random.normal(next(keys), shape, jnp.float32)

    p = {
        'fc1_w': w((D, input_size), input_size),          # Linear(input_size, D, bias=False)
        'fc2_w': w((D // 2, D), D),                       # Linear(D, D//2, bias=False)
        'score_w': w((1, D // 2), D // 2),                # Linear(D//2, 1, bias=False)
        'lnf_g': g((D,)), 'lnf_b': b((D,)),               # final LayerNorm(D)
        'pe': positional_encoding(160, input_size)[:seq_len],
    }
    per = {k: [] for k in ['in_proj_w', 'in_proj_b', 'out_proj_w', 'out_proj_b',
                           'ln1_g', 'ln1_b', 'ff1_w', 'ff1_b', 'ff2_w', 'ff2_b',
                           'ln2_g', 'ln2_b']}
    for _ in range(num_layers):
        per['in_proj_w'].append(w((3 * D, D), D))
        per['in_proj_b'].append(b((3 * D,)))
        per['out_proj_w'].append(w((D, D), D))
        per['out_proj_b'].append(b((D,)))
        per['ln1_g'].append(g((D,)))
        per['ln1_b'].append(b((D,)))
        per['ff1_w'].append(w((dim_ff, D), D))
        per['ff1_b'].append(b((dim_ff,)))
        per['ff2_w'].append(w((D, dim_ff), dim_ff))
        per['ff2_b'].append(b((D,)))
        per['ln2_g'].append(g((D,)))
        per['ln2_b'].append(b((D,)))
    for k_, v_ in per.items():
        p[k_] = jnp.stack(v_)
    return p


def pack_kernel_params(p, H, B):
    """Pack torch-style params into the 2 DMA slabs the kernel expects."""
    L, threeD, D = p['in_proj_w'].shape
    FF = p['ff1_w'].shape[1]
    F = p['fc1_w'].shape[1]
    S = p['pe'].shape[0]
    dh = D // H
    M = B * S
    lay = make_layout(B, S, F, D, H, FF, L)
    f32 = jnp.float32

    # ---- misc slab (ROWS, 128): broadcast vectors + small matmul RHS, lane-0 aligned ----
    misc = jnp.zeros((lay['ROWS'], 128), f32)
    wfc1t = p['fc1_w'].T                                   # (F, D)
    pe_fc1 = p['pe'] @ wfc1t                               # (S, D)
    misc = misc.at[lay['PE0']:lay['PE0'] + M, 0:D].set(jnp.tile(pe_fc1, (B, 1)))
    misc = misc.at[lay['WFC10']:lay['WFC10'] + F, 0:D].set(math.sqrt(F) * wfc1t)
    misc = misc.at[lay['FC20']:lay['FC20'] + D, 0:D // 2].set(p['fc2_w'].T)
    misc = misc.at[lay['SC0']:lay['SC0'] + D // 2, 0:1].set(p['score_w'].T)
    misc = misc.at[lay['GF0'], 0:D].set(p['lnf_g'])
    misc = misc.at[lay['BF0'], 0:D].set(p['lnf_b'])

    # per-layer bias / LayerNorm rows; fold the softmax 1/sqrt(dh) into the q bias
    in_b = p['in_proj_b'].at[:, :D].multiply(1.0 / math.sqrt(dh))      # (L, 3D)
    per_rows = [in_b, p['out_proj_b'], p['ff1_b'], p['ff2_b'],
                p['ln1_g'], p['ln1_b'], p['ln2_g'], p['ln2_b']]
    for l in range(L):
        for r, arr in enumerate(per_rows):
            row = lay['BIAS0'] + 8 * l + r
            misc = misc.at[row, 0:arr.shape[1]].set(arr[l])

    # ---- per-layer weight slab (L, WROWS, WCOLS): each operand at a 128-lane boundary ----
    w_slab = jnp.zeros((L, lay['WROWS'], lay['WCOLS']), f32)
    wqkvT = p['in_proj_w'].transpose(0, 2, 1)              # (L, D, 3D)
    wqkvT = wqkvT.at[:, :, :D].multiply(1.0 / math.sqrt(dh))   # fold softmax scale into Wq
    w_slab = w_slab.at[:, 0:D, lay['C_QKV']:lay['C_QKV'] + 3 * D].set(wqkvT)
    w_slab = w_slab.at[:, 0:D, lay['C_OUT']:lay['C_OUT'] + D].set(
        p['out_proj_w'].transpose(0, 2, 1))
    w_slab = w_slab.at[:, 0:D, lay['C_FF1']:lay['C_FF1'] + FF].set(
        p['ff1_w'].transpose(0, 2, 1))
    w_slab = w_slab.at[:, 0:FF, lay['C_FF2']:lay['C_FF2'] + D].set(
        p['ff2_w'].transpose(0, 2, 1))

    return dict(misc_slab=misc, w_slab=w_slab, layout=lay,
                dims=dict(B=B, S=S, F=F, D=D, H=H, FF=FF, L=L))


# --------------------------- pure-JAX reference (for checking) ---------------------------
def ref_forward(x, p, H):
    B, S, F = x.shape
    D = p['fc1_w'].shape[0]
    dh = D // H
    L = p['in_proj_w'].shape[0]

    h = x * math.sqrt(F) + p['pe'][None]
    h = jax.nn.relu(jnp.einsum('bsf,df->bsd', h, p['fc1_w']))
    for l in range(L):
        W, bb = p['in_proj_w'][l], p['in_proj_b'][l]
        q = h @ W[:D].T + bb[:D]
        k = h @ W[D:2 * D].T + bb[D:2 * D]
        v = h @ W[2 * D:].T + bb[2 * D:]
        sp = lambda t: t.reshape(B, S, H, dh).transpose(0, 2, 1, 3)
        qh, kh, vh = sp(q), sp(k), sp(v)
        s = jnp.einsum('bhqd,bhkd->bhqk', qh, kh) / math.sqrt(dh)
        a = jax.nn.softmax(s, axis=-1)
        o = jnp.einsum('bhqk,bhkd->bhqd', a, vh).transpose(0, 2, 1, 3).reshape(B, S, D)
        o = o @ p['out_proj_w'][l].T + p['out_proj_b'][l]
        h = _layer_norm(h + o, p['ln1_g'][l], p['ln1_b'][l])
        ff = jax.nn.relu(h @ p['ff1_w'][l].T + p['ff1_b'][l]) @ p['ff2_w'][l].T + p['ff2_b'][l]
        h = _layer_norm(h + ff, p['ln2_g'][l], p['ln2_b'][l])
    h = _layer_norm(h, p['lnf_g'], p['lnf_b'])
    last = h[:, -1, :]
    z = jax.nn.relu(last @ p['fc2_w'].T)
    return z @ p['score_w'].T


# ----------------------------------------- main -----------------------------------------
if __name__ == "__main__":
    # Trans(input_size=16, num_heads=4, dim_model=32, dim_ff=64, seq_len=8, num_layers=2)
    B, S, F = 2, 8, 16
    D, H, FF, L = 32, 4, 64, 2

    key = jax.random.PRNGKey(0)
    kx, kp_key = jax.random.split(key)
    x = jax.random.normal(kx, (B, S, F), jnp.float32)

    p = init_torch_style_params(kp_key, F, D, FF, S, L)
    kparams = pack_kernel_params(p, H, B)

    out = trans_forward(x, kparams)
    out = jax.block_until_ready(out)

    ref = ref_forward(x, p, H)
    assert out.shape == (B, 1)
    assert jnp.allclose(out, ref, atol=1e-2, rtol=1e-2), (out, ref)
    print("KERNEL_OK")
</pallas_src>

<mosaic_0001>
module attributes {stable_mosaic.version = 11 : i64} {
  func.func @kernel(%arg0: memref<16x16xf32, #tpu.memory_space<vmem>>, %arg1: memref<104x128xf32, #tpu.memory_space<vmem>>, %arg2: memref<2x64x512xf32, #tpu.memory_space<vmem>>, %arg3: memref<2x128xf32, #tpu.memory_space<vmem>>, %arg4: memref<16x32xf32, #tpu.memory_space<vmem>>) attributes {dimension_semantics = [], scalar_prefetch = 0 : i64, scratch_operands = 1 : i64, tpu.core_type = #tpu.core_type<tc>} {
    %c0 = arith.constant 0 : index
    %c0_0 = arith.constant 0 : index
    %0 = vector.load %arg1[%c0, %c0_0] : memref<104x128xf32, #tpu.memory_space<vmem>>, vector<16x32xf32>
    %c16 = arith.constant 16 : index
    %c0_1 = arith.constant 0 : index
    %1 = vector.load %arg1[%c16, %c0_1] : memref<104x128xf32, #tpu.memory_space<vmem>>, vector<16x32xf32>
    %c0_2 = arith.constant 0 : index
    %c0_3 = arith.constant 0 : index
    %2 = vector.load %arg0[%c0_2, %c0_3] : memref<16x16xf32, #tpu.memory_space<vmem>>, vector<16x16xf32>
    %cst = arith.constant dense<0.000000e+00> : vector<16x32xf32>
    %3 = tpu.matmul %2, %1, %cst {dimension_numbers = #tpu.dot_dimension_numbers<[1], [0], [0], [1], [0, 0, 1, 1], [], []>} : vector<16x16xf32>, vector<16x32xf32>, vector<16x32xf32> -> vector<16x32xf32>
    %4 = arith.addf %3, %0 : vector<16x32xf32>
    %cst_4 = arith.constant 0.000000e+00 : f32
    %5 = vector.broadcast %cst_4 : f32 to vector<16x32xf32>
    %6 = arith.maximumf %4, %5 : vector<16x32xf32>
    %c0_5 = arith.constant 0 : index
    %c0_6 = arith.constant 0 : index
    %c0_7 = arith.constant 0 : index
    %7 = vector.load %arg2[%c0_5, %c0_6, %c0_7] : memref<2x64x512xf32, #tpu.memory_space<vmem>>, vector<1x32x96xf32>
    %8 = vector.shape_cast %7 : vector<1x32x96xf32> to vector<32x96xf32>
    %c82 = arith.constant 82 : index
    %c0_8 = arith.constant 0 : index
    %9 = vector.load %arg1[%c82, %c0_8] : memref<104x128xf32, #tpu.memory_space<vmem>>, vector<1x96xf32>
    %cst_9 = arith.constant dense<0.000000e+00> : vector<16x96xf32>
    %10 = tpu.matmul %6, %8, %cst_9 {dimension_numbers = #tpu.dot_dimension_numbers<[1], [0], [0], [1], [0, 0, 1, 1], [], []>} : vector<16x32xf32>, vector<32x96xf32>, vector<16x96xf32> -> vector<16x96xf32>
    %11 = vector.broadcast %9 : vector<1x96xf32> to vector<16x96xf32>
    %12 = arith.addf %10, %11 : vector<16x96xf32>
    %13 = vector.extract_strided_slice %12 {offsets = [0, 0], sizes = [8, 8], strides = [1, 1]} : vector<16x96xf32> to vector<8x8xf32>
    %14 = vector.extract_strided_slice %12 {offsets = [0, 8], sizes = [8, 8], strides = [1, 1]} : vector<16x96xf32> to vector<8x8xf32>
    %15 = vector.extract_strided_slice %12 {offsets = [0, 16], sizes = [8, 8], strides = [1, 1]} : vector<16x96xf32> to vector<8x8xf32>
    %16 = vector.extract_strided_slice %12 {offsets = [0, 24], sizes = [8, 8], strides = [1, 1]} : vector<16x96xf32> to vector<8x8xf32>
    %17 = vector.extract_strided_slice %12 {offsets = [8, 0], sizes = [8, 8], strides = [1, 1]} : vector<16x96xf32> to vector<8x8xf32>
    %18 = vector.extract_strided_slice %12 {offsets = [8, 8], sizes = [8, 8], strides = [1, 1]} : vector<16x96xf32> to vector<8x8xf32>
    %19 = vector.extract_strided_slice %12 {offsets = [8, 16], sizes = [8, 8], strides = [1, 1]} : vector<16x96xf32> to vector<8x8xf32>
    %20 = vector.extract_strided_slice %12 {offsets = [8, 24], sizes = [8, 8], strides = [1, 1]} : vector<16x96xf32> to vector<8x8xf32>
    %21 = vector.shape_cast %13 : vector<8x8xf32> to vector<1x8x8xf32>
    %22 = vector.shape_cast %14 : vector<8x8xf32> to vector<1x8x8xf32>
    %23 = vector.shape_cast %15 : vector<8x8xf32> to vector<1x8x8xf32>
    %24 = vector.shape_cast %16 : vector<8x8xf32> to vector<1x8x8xf32>
    %25 = vector.shape_cast %17 : vector<8x8xf32> to vector<1x8x8xf32>
    %26 = vector.shape_cast %18 : vector<8x8xf32> to vector<1x8x8xf32>
    %27 = vector.shape_cast %19 : vector<8x8xf32> to vector<1x8x8xf32>
    %28 = vector.shape_cast %20 : vector<8x8xf32> to vector<1x8x8xf32>
    %29 = tpu.concatenate %21, %22, %23, %24, %25, %26, %27, %28 in 0 : vector<1x8x8xf32>, vector<1x8x8xf32>, vector<1x8x8xf32>, vector<1x8x8xf32>, vector<1x8x8xf32>, vector<1x8x8xf32>, vector<1x8x8xf32>, vector<1x8x8xf32> -> vector<8x8x8xf32>
    %30 = vector.extract_strided_slice %12 {offsets = [0, 32], sizes = [8, 8], strides = [1, 1]} : vector<16x96xf32> to vector<8x8xf32>
    %31 = vector.extract_strided_slice %12 {offsets = [0, 40], sizes = [8, 8], strides = [1, 1]} : vector<16x96xf32> to vector<8x8xf32>
    %32 = vector.extract_strided_slice %12 {offsets = [0, 48], sizes = [8, 8], strides = [1, 1]} : vector<16x96xf32> to vector<8x8xf32>
    %33 = vector.extract_strided_slice %12 {offsets = [0, 56], sizes = [8, 8], strides = [1, 1]} : vector<16x96xf32> to vector<8x8xf32>
    %34 = vector.extract_strided_slice %12 {offsets = [8, 32], sizes = [8, 8], strides = [1, 1]} : vector<16x96xf32> to vector<8x8xf32>
    %35 = vector.extract_strided_slice %12 {offsets = [8, 40], sizes = [8, 8], strides = [1, 1]} : vector<16x96xf32> to vector<8x8xf32>
    %36 = vector.extract_strided_slice %12 {offsets = [8, 48], sizes = [8, 8], strides = [1, 1]} : vector<16x96xf32> to vector<8x8xf32>
    %37 = vector.extract_strided_slice %12 {offsets = [8, 56], sizes = [8, 8], strides = [1, 1]} : vector<16x96xf32> to vector<8x8xf32>
    %38 = vector.shape_cast %30 : vector<8x8xf32> to vector<1x8x8xf32>
    %39 = vector.shape_cast %31 : vector<8x8xf32> to vector<1x8x8xf32>
    %40 = vector.shape_cast %32 : vector<8x8xf32> to vector<1x8x8xf32>
    %41 = vector.shape_cast %33 : vector<8x8xf32> to vector<1x8x8xf32>
    %42 = vector.shape_cast %34 : vector<8x8xf32> to vector<1x8x8xf32>
    %43 = vector.shape_cast %35 : vector<8x8xf32> to vector<1x8x8xf32>
    %44 = vector.shape_cast %36 : vector<8x8xf32> to vector<1x8x8xf32>
    %45 = vector.shape_cast %37 : vector<8x8xf32> to vector<1x8x8xf32>
    %46 = tpu.concatenate %38, %39, %40, %41, %42, %43, %44, %45 in 0 : vector<1x8x8xf32>, vector<1x8x8xf32>, vector<1x8x8xf32>, vector<1x8x8xf32>, vector<1x8x8xf32>, vector<1x8x8xf32>, vector<1x8x8xf32>, vector<1x8x8xf32> -> vector<8x8x8xf32>
    %47 = vector.extract_strided_slice %12 {offsets = [0, 64], sizes = [8, 8], strides = [1, 1]} : vector<16x96xf32> to vector<8x8xf32>
    %48 = vector.extract_strided_slice %12 {offsets = [0, 72], sizes = [8, 8], strides = [1, 1]} : vector<16x96xf32> to vector<8x8xf32>
    %49 = vector.extract_strided_slice %12 {offsets = [0, 80], sizes = [8, 8], strides = [1, 1]} : vector<16x96xf32> to vector<8x8xf32>
    %50 = vector.extract_strided_slice %12 {offsets = [0, 88], sizes = [8, 8], strides = [1, 1]} : vector<16x96xf32> to vector<8x8xf32>
    %51 = vector.extract_strided_slice %12 {offsets = [8, 64], sizes = [8, 8], strides = [1, 1]} : vector<16x96xf32> to vector<8x8xf32>
    %52 = vector.extract_strided_slice %12 {offsets = [8, 72], sizes = [8, 8], strides = [1, 1]} : vector<16x96xf32> to vector<8x8xf32>
    %53 = vector.extract_strided_slice %12 {offsets = [8, 80], sizes = [8, 8], strides = [1, 1]} : vector<16x96xf32> to vector<8x8xf32>
    %54 = vector.extract_strided_slice %12 {offsets = [8, 88], sizes = [8, 8], strides = [1, 1]} : vector<16x96xf32> to vector<8x8xf32>
    %55 = vector.shape_cast %47 : vector<8x8xf32> to vector<1x8x8xf32>
    %56 = vector.shape_cast %48 : vector<8x8xf32> to vector<1x8x8xf32>
    %57 = vector.shape_cast %49 : vector<8x8xf32> to vector<1x8x8xf32>
    %58 = vector.shape_cast %50 : vector<8x8xf32> to vector<1x8x8xf32>
    %59 = vector.shape_cast %51 : vector<8x8xf32> to vector<1x8x8xf32>
    %60 = vector.shape_cast %52 : vector<8x8xf32> to vector<1x8x8xf32>
    %61 = vector.shape_cast %53 : vector<8x8xf32> to vector<1x8x8xf32>
    %62 = vector.shape_cast %54 : vector<8x8xf32> to vector<1x8x8xf32>
    %63 = tpu.concatenate %55, %56, %57, %58, %59, %60, %61, %62 in 0 : vector<1x8x8xf32>, vector<1x8x8xf32>, vector<1x8x8xf32>, vector<1x8x8xf32>, vector<1x8x8xf32>, vector<1x8x8xf32>, vector<1x8x8xf32>, vector<1x8x8xf32> -> vector<8x8x8xf32>
    %cst_10 = arith.constant dense<0.000000e+00> : vector<8x8x8xf32>
    %64 = tpu.matmul %29, %46, %cst_10 {dimension_numbers = #tpu.dot_dimension_numbers<[2], [2], [1], [1], [0, 0, 0, 1, 1, 1], [0], [0]>} : vector<8x8x8xf32>, vector<8x8x8xf32>, vector<8x8x8xf32> -> vector<8x8x8xf32>
    %cst_11 = arith.constant dense<0xFF800000> : vector<8x8xf32>
    %65 = vector.multi_reduction <maximumf>, %64, %cst_11 [2] : vector<8x8x8xf32> to vector<8x8xf32>
    %66 = vector.shape_cast %65 : vector<8x8xf32> to vector<8x8x1xf32>
    %67 = vector.broadcast %66 : vector<8x8x1xf32> to vector<8x8x8xf32>
    %68 = arith.subf %64, %67 : vector<8x8x8xf32>
    %69 = math.exp %68 : vector<8x8x8xf32>
    %cst_12 = arith.constant dense<0.000000e+00> : vector<8x8xf32>
    %70 = vector.multi_reduction <add>, %69, %cst_12 [2] : vector<8x8x8xf32> to vector<8x8xf32>
    %71 = vector.shape_cast %70 : vector<8x8xf32> to vector<8x8x1xf32>
    %72 = tpu.reciprocal %71 {approx = true} : vector<8x8x1xf32> -> vector<8x8x1xf32>
    %73 = vector.broadcast %72 : vector<8x8x1xf32> to vector<8x8x8xf32>
    %74 = arith.mulf %69, %73 : vector<8x8x8xf32>
    %cst_13 = arith.constant dense<0.000000e+00> : vector<8x8x8xf32>
    %75 = tpu.matmul %74, %63, %cst_13 {dimension_numbers = #tpu.dot_dimension_numbers<[2], [1], [1], [2], [0, 0, 0, 1, 1, 2], [0], [0]>} : vector<8x8x8xf32>, vector<8x8x8xf32>, vector<8x8x8xf32> -> vector<8x8x8xf32>
    %76 = vector.extract_strided_slice %75 {offsets = [0, 0, 0], sizes = [1, 8, 8], strides = [1, 1, 1]} : vector<8x8x8xf32> to vector<1x8x8xf32>
    %77 = vector.shape_cast %76 : vector<1x8x8xf32> to vector<8x8xf32>
    %c0_14 = arith.constant 0 : index
    %c0_15 = arith.constant 0 : index
    %78 = vector.load %arg4[%c0_14, %c0_15] : memref<16x32xf32, #tpu.memory_space<vmem>>, vector<8x8xf32>
    tpu.vector_store %arg4[%c0_14, %c0_15], %77 {strides = array<i32>} : memref<16x32xf32, #tpu.memory_space<vmem>>, vector<8x8xf32>,
    %79 = vector.extract_strided_slice %75 {offsets = [1, 0, 0], sizes = [1, 8, 8], strides = [1, 1, 1]} : vector<8x8x8xf32> to vector<1x8x8xf32>
    %80 = vector.shape_cast %79 : vector<1x8x8xf32> to vector<8x8xf32>
    %c0_16 = arith.constant 0 : index
    %c8 = arith.constant 8 : index
    %81 = vector.load %arg4[%c0_16, %c8] : memref<16x32xf32, #tpu.memory_space<vmem>>, vector<8x8xf32>
    tpu.vector_store %arg4[%c0_16, %c8], %80 {strides = array<i32>} : memref<16x32xf32, #tpu.memory_space<vmem>>, vector<8x8xf32>,
    %82 = vector.extract_strided_slice %75 {offsets = [2, 0, 0], sizes = [1, 8, 8], strides = [1, 1, 1]} : vector<8x8x8xf32> to vector<1x8x8xf32>
    %83 = vector.shape_cast %82 : vector<1x8x8xf32> to vector<8x8xf32>
    %c0_17 = arith.constant 0 : index
    %c16_18 = arith.constant 16 : index
    %84 = vector.load %arg4[%c0_17, %c16_18] : memref<16x32xf32, #tpu.memory_space<vmem>>, vector<8x8xf32>
    tpu.vector_store %arg4[%c0_17, %c16_18], %83 {strides = array<i32>} : memref<16x32xf32, #tpu.memory_space<vmem>>, vector<8x8xf32>,
    %85 = vector.extract_strided_slice %75 {offsets = [3, 0, 0], sizes = [1, 8, 8], strides = [1, 1, 1]} : vector<8x8x8xf32> to vector<1x8x8xf32>
    %86 = vector.shape_cast %85 : vector<1x8x8xf32> to vector<8x8xf32>
    %c0_19 = arith.constant 0 : index
    %c24 = arith.constant 24 : index
    %87 = vector.load %arg4[%c0_19, %c24] : memref<16x32xf32, #tpu.memory_space<vmem>>, vector<8x8xf32>
    tpu.vector_store %arg4[%c0_19, %c24], %86 {strides = array<i32>} : memref<16x32xf32, #tpu.memory_space<vmem>>, vector<8x8xf32>,
    %88 = vector.extract_strided_slice %75 {offsets = [4, 0, 0], sizes = [1, 8, 8], strides = [1, 1, 1]} : vector<8x8x8xf32> to vector<1x8x8xf32>
    %89 = vector.shape_cast %88 : vector<1x8x8xf32> to vector<8x8xf32>
    %c8_20 = arith.constant 8 : index
    %c0_21 = arith.constant 0 : index
    %90 = vector.load %arg4[%c8_20, %c0_21] : memref<16x32xf32, #tpu.memory_space<vmem>>, vector<8x8xf32>
    tpu.vector_store %arg4[%c8_20, %c0_21], %89 {strides = array<i32>} : memref<16x32xf32, #tpu.memory_space<vmem>>, vector<8x8xf32>,
    %91 = vector.extract_strided_slice %75 {offsets = [5, 0, 0], sizes = [1, 8, 8], strides = [1, 1, 1]} : vector<8x8x8xf32> to vector<1x8x8xf32>
    %92 = vector.shape_cast %91 : vector<1x8x8xf32> to vector<8x8xf32>
    %c8_22 = arith.constant 8 : index
    %c8_23 = arith.constant 8 : index
    %93 = vector.load %arg4[%c8_22, %c8_23] : memref<16x32xf32, #tpu.memory_space<vmem>>, vector<8x8xf32>
    tpu.vector_store %arg4[%c8_22, %c8_23], %92 {strides = array<i32>} : memref<16x32xf32, #tpu.memory_space<vmem>>, vector<8x8xf32>,
    %94 = vector.extract_strided_slice %75 {offsets = [6, 0, 0], sizes = [1, 8, 8], strides = [1, 1, 1]} : vector<8x8x8xf32> to vector<1x8x8xf32>
    %95 = vector.shape_cast %94 : vector<1x8x8xf32> to vector<8x8xf32>
    %c8_24 = arith.constant 8 : index
    %c16_25 = arith.constant 16 : index
    %96 = vector.load %arg4[%c8_24, %c16_25] : memref<16x32xf32, #tpu.memory_space<vmem>>, vector<8x8xf32>
    tpu.vector_store %arg4[%c8_24, %c16_25], %95 {strides = array<i32>} : memref<16x32xf32, #tpu.memory_space<vmem>>, vector<8x8xf32>,
    %97 = vector.extract_strided_slice %75 {offsets = [7, 0, 0], sizes = [1, 8, 8], strides = [1, 1, 1]} : vector<8x8x8xf32> to vector<1x8x8xf32>
    %98 = vector.shape_cast %97 : vector<1x8x8xf32> to vector<8x8xf32>
    %c8_26 = arith.constant 8 : index
    %c24_27 = arith.constant 24 : index
    %99 = vector.load %arg4[%c8_26, %c24_27] : memref<16x32xf32, #tpu.memory_space<vmem>>, vector<8x8xf32>
    tpu.vector_store %arg4[%c8_26, %c24_27], %98 {strides = array<i32>} : memref<16x32xf32, #tpu.memory_space<vmem>>, vector<8x8xf32>,
    %c0_28 = arith.constant 0 : index
    %c0_29 = arith.constant 0 : index
    %100 = vector.load %arg4[%c0_28, %c0_29] : memref<16x32xf32, #tpu.memory_space<vmem>>, vector<16x32xf32>
    %c0_30 = arith.constant 0 : index
    %c0_31 = arith.constant 0 : index
    %c128 = arith.constant 128 : index
    %101 = vector.load %arg2[%c0_30, %c0_31, %c128] : memref<2x64x512xf32, #tpu.memory_space<vmem>>, vector<1x32x32xf32>
    %102 = vector.shape_cast %101 : vector<1x32x32xf32> to vector<32x32xf32>
    %c83 = arith.constant 83 : index
    %c0_32 = arith.constant 0 : index
    %103 = vector.load %arg1[%c83, %c0_32] : memref<104x128xf32, #tpu.memory_space<vmem>>, vector<1x32xf32>
    %cst_33 = arith.constant dense<0.000000e+00> : vector<16x32xf32>
    %104 = tpu.matmul %100, %102, %cst_33 {dimension_numbers = #tpu.dot_dimension_numbers<[1], [0], [0], [1], [0, 0, 1, 1], [], []>} : vector<16x32xf32>, vector<32x32xf32>, vector<16x32xf32> -> vector<16x32xf32>
    %105 = vector.broadcast %103 : vector<1x32xf32> to vector<16x32xf32>
    %106 = arith.addf %104, %105 : vector<16x32xf32>
    %107 = arith.addf %6, %106 : vector<16x32xf32>
    %c86 = arith.constant 86 : index
    %c0_34 = arith.constant 0 : index
    %108 = vector.load %arg1[%c86, %c0_34] : memref<104x128xf32, #tpu.memory_space<vmem>>, vector<1x32xf32>
    %c87 = arith.constant 87 : index
    %c0_35 = arith.constant 0 : index
    %109 = vector.load %arg1[%c87, %c0_35] : memref<104x128xf32, #tpu.memory_space<vmem>>, vector<1x32xf32>
    %cst_36 = arith.constant dense<0.000000e+00> : vector<16xf32>
    %110 = vector.multi_reduction <add>, %107, %cst_36 [1] : vector<16x32xf32> to vector<16xf32>
    %111 = vector.shape_cast %110 : vector<16xf32> to vector<16x1xf32>
    %cst_37 = arith.constant 3.200000e+01 : f32
    %112 = vector.broadcast %cst_37 : f32 to vector<16x1xf32>
    %113 = arith.divf %111, %112 : vector<16x1xf32>
    %114 = vector.broadcast %113 : vector<16x1xf32> to vector<16x32xf32>
    %115 = arith.subf %107, %114 : vector<16x32xf32>
    %116 = arith.mulf %115, %115 : vector<16x32xf32>
    %cst_38 = arith.constant dense<0.000000e+00> : vector<16xf32>
    %117 = vector.multi_reduction <add>, %116, %cst_38 [1] : vector<16x32xf32> to vector<16xf32>
    %118 = vector.shape_cast %117 : vector<16xf32> to vector<16x1xf32>
    %cst_39 = arith.constant 3.200000e+01 : f32
    %119 = vector.broadcast %cst_39 : f32 to vector<16x1xf32>
    %120 = arith.divf %118, %119 : vector<16x1xf32>
    %121 = vector.broadcast %113 : vector<16x1xf32> to vector<16x32xf32>
    %122 = arith.subf %107, %121 : vector<16x32xf32>
    %cst_40 = arith.constant 9.99999974E-6 : f32
    %123 = vector.broadcast %cst_40 : f32 to vector<16x1xf32>
    %124 = arith.addf %120, %123 : vector<16x1xf32>
    %125 = math.rsqrt %124 : vector<16x1xf32>
    %126 = vector.broadcast %125 : vector<16x1xf32> to vector<16x32xf32>
    %127 = arith.mulf %122, %126 : vector<16x32xf32>
    %128 = vector.broadcast %108 : vector<1x32xf32> to vector<16x32xf32>
    %129 = arith.mulf %127, %128 : vector<16x32xf32>
    %130 = vector.broadcast %109 : vector<1x32xf32> to vector<16x32xf32>
    %131 = arith.addf %129, %130 : vector<16x32xf32>
    %c0_41 = arith.constant 0 : index
    %c0_42 = arith.constant 0 : index
    %c256 = arith.constant 256 : index
    %132 = vector.load %arg2[%c0_41, %c0_42, %c256] : memref<2x64x512xf32, #tpu.memory_space<vmem>>, vector<1x32x64xf32>
    %133 = vector.shape_cast %132 : vector<1x32x64xf32> to vector<32x64xf32>
    %c84 = arith.constant 84 : index
    %c0_43 = arith.constant 0 : index
    %134 = vector.load %arg1[%c84, %c0_43] : memref<104x128xf32, #tpu.memory_space<vmem>>, vector<1x64xf32>
    %cst_44 = arith.constant dense<0.000000e+00> : vector<16x64xf32>
    %135 = tpu.matmul %131, %133, %cst_44 {dimension_numbers = #tpu.dot_dimension_numbers<[1], [0], [0], [1], [0, 0, 1, 1], [], []>} : vector<16x32xf32>, vector<32x64xf32>, vector<16x64xf32> -> vector<16x64xf32>
    %136 = vector.broadcast %134 : vector<1x64xf32> to vector<16x64xf32>
    %137 = arith.addf %135, %136 : vector<16x64xf32>
    %cst_45 = arith.constant 0.000000e+00 : f32
    %138 = vector.broadcast %cst_45 : f32 to vector<16x64xf32>
    %139 = arith.maximumf %137, %138 : vector<16x64xf32>
    %c0_46 = arith.constant 0 : index
    %c0_47 = arith.constant 0 : index
    %c384 = arith.constant 384 : index
    %140 = vector.load %arg2[%c0_46, %c0_47, %c384] : memref<2x64x512xf32, #tpu.memory_space<vmem>>, vector<1x64x32xf32>
    %141 = vector.shape_cast %140 : vector<1x64x32xf32> to vector<64x32xf32>
    %c85 = arith.constant 85 : index
    %c0_48 = arith.constant 0 : index
    %142 = vector.load %arg1[%c85, %c0_48] : memref<104x128xf32, #tpu.memory_space<vmem>>, vector<1x32xf32>
    %cst_49 = arith.constant dense<0.000000e+00> : vector<16x32xf32>
    %143 = tpu.matmul %139, %141, %cst_49 {dimension_numbers = #tpu.dot_dimension_numbers<[1], [0], [0], [1], [0, 0, 1, 1], [], []>} : vector<16x64xf32>, vector<64x32xf32>, vector<16x32xf32> -> vector<16x32xf32>
    %144 = vector.broadcast %142 : vector<1x32xf32> to vector<16x32xf32>
    %145 = arith.addf %143, %144 : vector<16x32xf32>
    %146 = arith.addf %131, %145 : vector<16x32xf32>
    %c88 = arith.constant 88 : index
    %c0_50 = arith.constant 0 : index
    %147 = vector.load %arg1[%c88, %c0_50] : memref<104x128xf32, #tpu.memory_space<vmem>>, vector<1x32xf32>
    %c89 = arith.constant 89 : index
    %c0_51 = arith.constant 0 : index
    %148 = vector.load %arg1[%c89, %c0_51] : memref<104x128xf32, #tpu.memory_space<vmem>>, vector<1x32xf32>
    %cst_52 = arith.constant dense<0.000000e+00> : vector<16xf32>
    %149 = vector.multi_reduction <add>, %146, %cst_52 [1] : vector<16x32xf32> to vector<16xf32>
    %150 = vector.shape_cast %149 : vector<16xf32> to vector<16x1xf32>
    %cst_53 = arith.constant 3.200000e+01 : f32
    %151 = vector.broadcast %cst_53 : f32 to vector<16x1xf32>
    %152 = arith.divf %150, %151 : vector<16x1xf32>
    %153 = vector.broadcast %152 : vector<16x1xf32> to vector<16x32xf32>
    %154 = arith.subf %146, %153 : vector<16x32xf32>
    %155 = arith.mulf %154, %154 : vector<16x32xf32>
    %cst_54 = arith.constant dense<0.000000e+00> : vector<16xf32>
    %156 = vector.multi_reduction <add>, %155, %cst_54 [1] : vector<16x32xf32> to vector<16xf32>
    %157 = vector.shape_cast %156 : vector<16xf32> to vector<16x1xf32>
    %cst_55 = arith.constant 3.200000e+01 : f32
    %158 = vector.broadcast %cst_55 : f32 to vector<16x1xf32>
    %159 = arith.divf %157, %158 : vector<16x1xf32>
    %160 = vector.broadcast %152 : vector<16x1xf32> to vector<16x32xf32>
    %161 = arith.subf %146, %160 : vector<16x32xf32>
    %cst_56 = arith.constant 9.99999974E-6 : f32
    %162 = vector.broadcast %cst_56 : f32 to vector<16x1xf32>
    %163 = arith.addf %159, %162 : vector<16x1xf32>
    %164 = math.rsqrt %163 : vector<16x1xf32>
    %165 = vector.broadcast %164 : vector<16x1xf32> to vector<16x32xf32>
    %166 = arith.mulf %161, %165 : vector<16x32xf32>
    %167 = vector.broadcast %147 : vector<1x32xf32> to vector<16x32xf32>
    %168 = arith.mulf %166, %167 : vector<16x32xf32>
    %169 = vector.broadcast %148 : vector<1x32xf32> to vector<16x32xf32>
    %170 = arith.addf %168, %169 : vector<16x32xf32>
    %c1 = arith.constant 1 : index
    %c0_57 = arith.constant 0 : index
    %c0_58 = arith.constant 0 : index
    %171 = vector.load %arg2[%c1, %c0_57, %c0_58] : memref<2x64x512xf32, #tpu.memory_space<vmem>>, vector<1x32x96xf32>
    %172 = vector.shape_cast %171 : vector<1x32x96xf32> to vector<32x96xf32>
    %c90 = arith.constant 90 : index
    %c0_59 = arith.constant 0 : index
    %173 = vector.load %arg1[%c90, %c0_59] : memref<104x128xf32, #tpu.memory_space<vmem>>, vector<1x96xf32>
    %cst_60 = arith.constant dense<0.000000e+00> : vector<16x96xf32>
    %174 = tpu.matmul %170, %172, %cst_60 {dimension_numbers = #tpu.dot_dimension_numbers<[1], [0], [0], [1], [0, 0, 1, 1], [], []>} : vector<16x32xf32>, vector<32x96xf32>, vector<16x96xf32> -> vector<16x96xf32>
    %175 = vector.broadcast %173 : vector<1x96xf32> to vector<16x96xf32>
    %176 = arith.addf %174, %175 : vector<16x96xf32>
    %177 = vector.extract_strided_slice %176 {offsets = [0, 0], sizes = [8, 8], strides = [1, 1]} : vector<16x96xf32> to vector<8x8xf32>
    %178 = vector.extract_strided_slice %176 {offsets = [0, 8], sizes = [8, 8], strides = [1, 1]} : vector<16x96xf32> to vector<8x8xf32>
    %179 = vector.extract_strided_slice %176 {offsets = [0, 16], sizes = [8, 8], strides = [1, 1]} : vector<16x96xf32> to vector<8x8xf32>
    %180 = vector.extract_strided_slice %176 {offsets = [0, 24], sizes = [8, 8], strides = [1, 1]} : vector<16x96xf32> to vector<8x8xf32>
    %181 = vector.extract_strided_slice %176 {offsets = [8, 0], sizes = [8, 8], strides = [1, 1]} : vector<16x96xf32> to vector<8x8xf32>
    %182 = vector.extract_strided_slice %176 {offsets = [8, 8], sizes = [8, 8], strides = [1, 1]} : vector<16x96xf32> to vector<8x8xf32>
    %183 = vector.extract_strided_slice %176 {offsets = [8, 16], sizes = [8, 8], strides = [1, 1]} : vector<16x96xf32> to vector<8x8xf32>
    %184 = vector.extract_strided_slice %176 {offsets = [8, 24], sizes = [8, 8], strides = [1, 1]} : vector<16x96xf32> to vector<8x8xf32>
    %185 = vector.shape_cast %177 : vector<8x8xf32> to vector<1x8x8xf32>
    %186 = vector.shape_cast %178 : vector<8x8xf32> to vector<1x8x8xf32>
    %187 = vector.shape_cast %179 : vector<8x8xf32> to vector<1x8x8xf32>
    %188 = vector.shape_cast %180 : vector<8x8xf32> to vector<1x8x8xf32>
    %189 = vector.shape_cast %181 : vector<8x8xf32> to vector<1x8x8xf32>
    %190 = vector.shape_cast %182 : vector<8x8xf32> to vector<1x8x8xf32>
    %191 = vector.shape_cast %183 : vector<8x8xf32> to vector<1x8x8xf32>
    %192 = vector.shape_cast %184 : vector<8x8xf32> to vector<1x8x8xf32>
    %193 = tpu.concatenate %185, %186, %187, %188, %189, %190, %191, %192 in 0 : vector<1x8x8xf32>, vector<1x8x8xf32>, vector<1x8x8xf32>, vector<1x8x8xf32>, vector<1x8x8xf32>, vector<1x8x8xf32>, vector<1x8x8xf32>, vector<1x8x8xf32> -> vector<8x8x8xf32>
    %194 = vector.extract_strided_slice %176 {offsets = [0, 32], sizes = [8, 8], strides = [1, 1]} : vector<16x96xf32> to vector<8x8xf32>
    %195 = vector.extract_strided_slice %176 {offsets = [0, 40], sizes = [8, 8], strides = [1, 1]} : vector<16x96xf32> to vector<8x8xf32>
    %196 = vector.extract_strided_slice %176 {offsets = [0, 48], sizes = [8, 8], strides = [1, 1]} : vector<16x96xf32> to vector<8x8xf32>
    %197 = vector.extract_strided_slice %176 {offsets = [0, 56], sizes = [8, 8], strides = [1, 1]} : vector<16x96xf32> to vector<8x8xf32>
    %198 = vector.extract_strided_slice %176 {offsets = [8, 32], sizes = [8, 8], strides = [1, 1]} : vector<16x96xf32> to vector<8x8xf32>
    %199 = vector.extract_strided_slice %176 {offsets = [8, 40], sizes = [8, 8], strides = [1, 1]} : vector<16x96xf32> to vector<8x8xf32>
    %200 = vector.extract_strided_slice %176 {offsets = [8, 48], sizes = [8, 8], strides = [1, 1]} : vector<16x96xf32> to vector<8x8xf32>
    %201 = vector.extract_strided_slice %176 {offsets = [8, 56], sizes = [8, 8], strides = [1, 1]} : vector<16x96xf32> to vector<8x8xf32>
    %202 = vector.shape_cast %194 : vector<8x8xf32> to vector<1x8x8xf32>
    %203 = vector.shape_cast %195 : vector<8x8xf32> to vector<1x8x8xf32>
    %204 = vector.shape_cast %196 : vector<8x8xf32> to vector<1x8x8xf32>
    %205 = vector.shape_cast %197 : vector<8x8xf32> to vector<1x8x8xf32>
    %206 = vector.shape_cast %198 : vector<8x8xf32> to vector<1x8x8xf32>
    %207 = vector.shape_cast %199 : vector<8x8xf32> to vector<1x8x8xf32>
    %208 = vector.shape_cast %200 : vector<8x8xf32> to vector<1x8x8xf32>
    %209 = vector.shape_cast %201 : vector<8x8xf32> to vector<1x8x8xf32>
    %210 = tpu.concatenate %202, %203, %204, %205, %206, %207, %208, %209 in 0 : vector<1x8x8xf32>, vector<1x8x8xf32>, vector<1x8x8xf32>, vector<1x8x8xf32>, vector<1x8x8xf32>, vector<1x8x8xf32>, vector<1x8x8xf32>, vector<1x8x8xf32> -> vector<8x8x8xf32>
    %211 = vector.extract_strided_slice %176 {offsets = [0, 64], sizes = [8, 8], strides = [1, 1]} : vector<16x96xf32> to vector<8x8xf32>
    %212 = vector.extract_strided_slice %176 {offsets = [0, 72], sizes = [8, 8], strides = [1, 1]} : vector<16x96xf32> to vector<8x8xf32>
    %213 = vector.extract_strided_slice %176 {offsets = [0, 80], sizes = [8, 8], strides = [1, 1]} : vector<16x96xf32> to vector<8x8xf32>
    %214 = vector.extract_strided_slice %176 {offsets = [0, 88], sizes = [8, 8], strides = [1, 1]} : vector<16x96xf32> to vector<8x8xf32>
    %215 = vector.extract_strided_slice %176 {offsets = [8, 64], sizes = [8, 8], strides = [1, 1]} : vector<16x96xf32> to vector<8x8xf32>
    %216 = vector.extract_strided_slice %176 {offsets = [8, 72], sizes = [8, 8], strides = [1, 1]} : vector<16x96xf32> to vector<8x8xf32>
    %217 = vector.extract_strided_slice %176 {offsets = [8, 80], sizes = [8, 8], strides = [1, 1]} : vector<16x96xf32> to vector<8x8xf32>
    %218 = vector.extract_strided_slice %176 {offsets = [8, 88], sizes = [8, 8], strides = [1, 1]} : vector<16x96xf32> to vector<8x8xf32>
    %219 = vector.shape_cast %211 : vector<8x8xf32> to vector<1x8x8xf32>
    %220 = vector.shape_cast %212 : vector<8x8xf32> to vector<1x8x8xf32>
    %221 = vector.shape_cast %213 : vector<8x8xf32> to vector<1x8x8xf32>
    %222 = vector.shape_cast %214 : vector<8x8xf32> to vector<1x8x8xf32>
    %223 = vector.shape_cast %215 : vector<8x8xf32> to vector<1x8x8xf32>
    %224 = vector.shape_cast %216 : vector<8x8xf32> to vector<1x8x8xf32>
    %225 = vector.shape_cast %217 : vector<8x8xf32> to vector<1x8x8xf32>
    %226 = vector.shape_cast %218 : vector<8x8xf32> to vector<1x8x8xf32>
    %227 = tpu.concatenate %219, %220, %221, %222, %223, %224, %225, %226 in 0 : vector<1x8x8xf32>, vector<1x8x8xf32>, vector<1x8x8xf32>, vector<1x8x8xf32>, vector<1x8x8xf32>, vector<1x8x8xf32>, vector<1x8x8xf32>, vector<1x8x8xf32> -> vector<8x8x8xf32>
    %cst_61 = arith.constant dense<0.000000e+00> : vector<8x8x8xf32>
    %228 = tpu.matmul %193, %210, %cst_61 {dimension_numbers = #tpu.dot_dimension_numbers<[2], [2], [1], [1], [0, 0, 0, 1, 1, 1], [0], [0]>} : vector<8x8x8xf32>, vector<8x8x8xf32>, vector<8x8x8xf32> -> vector<8x8x8xf32>
    %cst_62 = arith.constant dense<0xFF800000> : vector<8x8xf32>
    %229 = vector.multi_reduction <maximumf>, %228, %cst_62 [2] : vector<8x8x8xf32> to vector<8x8xf32>
    %230 = vector.shape_cast %229 : vector<8x8xf32> to vector<8x8x1xf32>
    %231 = vector.broadcast %230 : vector<8x8x1xf32> to vector<8x8x8xf32>
    %232 = arith.subf %228, %231 : vector<8x8x8xf32>
    %233 = math.exp %232 : vector<8x8x8xf32>
    %cst_63 = arith.constant dense<0.000000e+00> : vector<8x8xf32>
    %234 = vector.multi_reduction <add>, %233, %cst_63 [2] : vector<8x8x8xf32> to vector<8x8xf32>
    %235 = vector.shape_cast %234 : vector<8x8xf32> to vector<8x8x1xf32>
    %236 = tpu.reciprocal %235 {approx = true} : vector<8x8x1xf32> -> vector<8x8x1xf32>
    %237 = vector.broadcast %236 : vector<8x8x1xf32> to vector<8x8x8xf32>
    %238 = arith.mulf %233, %237 : vector<8x8x8xf32>
    %cst_64 = arith.constant dense<0.000000e+00> : vector<8x8x8xf32>
    %239 = tpu.matmul %238, %227, %cst_64 {dimension_numbers = #tpu.dot_dimension_numbers<[2], [1], [1], [2], [0, 0, 0, 1, 1, 2], [0], [0]>} : vector<8x8x8xf32>, vector<8x8x8xf32>, vector<8x8x8xf32> -> vector<8x8x8xf32>
    %240 = vector.extract_strided_slice %239 {offsets = [0, 0, 0], sizes = [1, 8, 8], strides = [1, 1, 1]} : vector<8x8x8xf32> to vector<1x8x8xf32>
    %241 = vector.shape_cast %240 : vector<1x8x8xf32> to vector<8x8xf32>
    %c0_65 = arith.constant 0 : index
    %c0_66 = arith.constant 0 : index
    %242 = vector.load %arg4[%c0_65, %c0_66] : memref<16x32xf32, #tpu.memory_space<vmem>>, vector<8x8xf32>
    tpu.vector_store %arg4[%c0_65, %c0_66], %241 {strides = array<i32>} : memref<16x32xf32, #tpu.memory_space<vmem>>, vector<8x8xf32>,
    %243 = vector.extract_strided_slice %239 {offsets = [1, 0, 0], sizes = [1, 8, 8], strides = [1, 1, 1]} : vector<8x8x8xf32> to vector<1x8x8xf32>
    %244 = vector.shape_cast %243 : vector<1x8x8xf32> to vector<8x8xf32>
    %c0_67 = arith.constant 0 : index
    %c8_68 = arith.constant 8 : index
    %245 = vector.load %arg4[%c0_67, %c8_68] : memref<16x32xf32, #tpu.memory_space<vmem>>, vector<8x8xf32>
    tpu.vector_store %arg4[%c0_67, %c8_68], %244 {strides = array<i32>} : memref<16x32xf32, #tpu.memory_space<vmem>>, vector<8x8xf32>,
    %246 = vector.extract_strided_slice %239 {offsets = [2, 0, 0], sizes = [1, 8, 8], strides = [1, 1, 1]} : vector<8x8x8xf32> to vector<1x8x8xf32>
    %247 = vector.shape_cast %246 : vector<1x8x8xf32> to vector<8x8xf32>
    %c0_69 = arith.constant 0 : index
    %c16_70 = arith.constant 16 : index
    %248 = vector.load %arg4[%c0_69, %c16_70] : memref<16x32xf32, #tpu.memory_space<vmem>>, vector<8x8xf32>
    tpu.vector_store %arg4[%c0_69, %c16_70], %247 {strides = array<i32>} : memref<16x32xf32, #tpu.memory_space<vmem>>, vector<8x8xf32>,
    %249 = vector.extract_strided_slice %239 {offsets = [3, 0, 0], sizes = [1, 8, 8], strides = [1, 1, 1]} : vector<8x8x8xf32> to vector<1x8x8xf32>
    %250 = vector.shape_cast %249 : vector<1x8x8xf32> to vector<8x8xf32>
    %c0_71 = arith.constant 0 : index
    %c24_72 = arith.constant 24 : index
    %251 = vector.load %arg4[%c0_71, %c24_72] : memref<16x32xf32, #tpu.memory_space<vmem>>, vector<8x8xf32>
    tpu.vector_store %arg4[%c0_71, %c24_72], %250 {strides = array<i32>} : memref<16x32xf32, #tpu.memory_space<vmem>>, vector<8x8xf32>,
    %252 = vector.extract_strided_slice %239 {offsets = [4, 0, 0], sizes = [1, 8, 8], strides = [1, 1, 1]} : vector<8x8x8xf32> to vector<1x8x8xf32>
    %253 = vector.shape_cast %252 : vector<1x8x8xf32> to vector<8x8xf32>
    %c8_73 = arith.constant 8 : index
    %c0_74 = arith.constant 0 : index
    %254 = vector.load %arg4[%c8_73, %c0_74] : memref<16x32xf32, #tpu.memory_space<vmem>>, vector<8x8xf32>
    tpu.vector_store %arg4[%c8_73, %c0_74], %253 {strides = array<i32>} : memref<16x32xf32, #tpu.memory_space<vmem>>, vector<8x8xf32>,
    %255 = vector.extract_strided_slice %239 {offsets = [5, 0, 0], sizes = [1, 8, 8], strides = [1, 1, 1]} : vector<8x8x8xf32> to vector<1x8x8xf32>
    %256 = vector.shape_cast %255 : vector<1x8x8xf32> to vector<8x8xf32>
    %c8_75 = arith.constant 8 : index
    %c8_76 = arith.constant 8 : index
    %257 = vector.load %arg4[%c8_75, %c8_76] : memref<16x32xf32, #tpu.memory_space<vmem>>, vector<8x8xf32>
    tpu.vector_store %arg4[%c8_75, %c8_76], %256 {strides = array<i32>} : memref<16x32xf32, #tpu.memory_space<vmem>>, vector<8x8xf32>,
    %258 = vector.extract_strided_slice %239 {offsets = [6, 0, 0], sizes = [1, 8, 8], strides = [1, 1, 1]} : vector<8x8x8xf32> to vector<1x8x8xf32>
    %259 = vector.shape_cast %258 : vector<1x8x8xf32> to vector<8x8xf32>
    %c8_77 = arith.constant 8 : index
    %c16_78 = arith.constant 16 : index
    %260 = vector.load %arg4[%c8_77, %c16_78] : memref<16x32xf32, #tpu.memory_space<vmem>>, vector<8x8xf32>
    tpu.vector_store %arg4[%c8_77, %c16_78], %259 {strides = array<i32>} : memref<16x32xf32, #tpu.memory_space<vmem>>, vector<8x8xf32>,
    %261 = vector.extract_strided_slice %239 {offsets = [7, 0, 0], sizes = [1, 8, 8], strides = [1, 1, 1]} : vector<8x8x8xf32> to vector<1x8x8xf32>
    %262 = vector.shape_cast %261 : vector<1x8x8xf32> to vector<8x8xf32>
    %c8_79 = arith.constant 8 : index
    %c24_80 = arith.constant 24 : index
    %263 = vector.load %arg4[%c8_79, %c24_80] : memref<16x32xf32, #tpu.memory_space<vmem>>, vector<8x8xf32>
    tpu.vector_store %arg4[%c8_79, %c24_80], %262 {strides = array<i32>} : memref<16x32xf32, #tpu.memory_space<vmem>>, vector<8x8xf32>,
    %c0_81 = arith.constant 0 : index
    %c0_82 = arith.constant 0 : index
    %264 = vector.load %arg4[%c0_81, %c0_82] : memref<16x32xf32, #tpu.memory_space<vmem>>, vector<16x32xf32>
    %c1_83 = arith.constant 1 : index
    %c0_84 = arith.constant 0 : index
    %c128_85 = arith.constant 128 : index
    %265 = vector.load %arg2[%c1_83, %c0_84, %c128_85] : memref<2x64x512xf32, #tpu.memory_space<vmem>>, vector<1x32x32xf32>
    %266 = vector.shape_cast %265 : vector<1x32x32xf32> to vector<32x32xf32>
    %c91 = arith.constant 91 : index
    %c0_86 = arith.constant 0 : index
    %267 = vector.load %arg1[%c91, %c0_86] : memref<104x128xf32, #tpu.memory_space<vmem>>, vector<1x32xf32>
    %cst_87 = arith.constant dense<0.000000e+00> : vector<16x32xf32>
    %268 = tpu.matmul %264, %266, %cst_87 {dimension_numbers = #tpu.dot_dimension_numbers<[1], [0], [0], [1], [0, 0, 1, 1], [], []>} : vector<16x32xf32>, vector<32x32xf32>, vector<16x32xf32> -> vector<16x32xf32>
    %269 = vector.broadcast %267 : vector<1x32xf32> to vector<16x32xf32>
    %270 = arith.addf %268, %269 : vector<16x32xf32>
    %271 = arith.addf %170, %270 : vector<16x32xf32>
    %c94 = arith.constant 94 : index
    %c0_88 = arith.constant 0 : index
    %272 = vector.load %arg1[%c94, %c0_88] : memref<104x128xf32, #tpu.memory_space<vmem>>, vector<1x32xf32>
    %c95 = arith.constant 95 : index
    %c0_89 = arith.constant 0 : index
    %273 = vector.load %arg1[%c95, %c0_89] : memref<104x128xf32, #tpu.memory_space<vmem>>, vector<1x32xf32>
    %cst_90 = arith.constant dense<0.000000e+00> : vector<16xf32>
    %274 = vector.multi_reduction <add>, %271, %cst_90 [1] : vector<16x32xf32> to vector<16xf32>
    %275 = vector.shape_cast %274 : vector<16xf32> to vector<16x1xf32>
    %cst_91 = arith.constant 3.200000e+01 : f32
    %276 = vector.broadcast %cst_91 : f32 to vector<16x1xf32>
    %277 = arith.divf %275, %276 : vector<16x1xf32>
    %278 = vector.broadcast %277 : vector<16x1xf32> to vector<16x32xf32>
    %279 = arith.subf %271, %278 : vector<16x32xf32>
    %280 = arith.mulf %279, %279 : vector<16x32xf32>
    %cst_92 = arith.constant dense<0.000000e+00> : vector<16xf32>
    %281 = vector.multi_reduction <add>, %280, %cst_92 [1] : vector<16x32xf32> to vector<16xf32>
    %282 = vector.shape_cast %281 : vector<16xf32> to vector<16x1xf32>
    %cst_93 = arith.constant 3.200000e+01 : f32
    %283 = vector.broadcast %cst_93 : f32 to vector<16x1xf32>
    %284 = arith.divf %282, %283 : vector<16x1xf32>
    %285 = vector.broadcast %277 : vector<16x1xf32> to vector<16x32xf32>
    %286 = arith.subf %271, %285 : vector<16x32xf32>
    %cst_94 = arith.constant 9.99999974E-6 : f32
    %287 = vector.broadcast %cst_94 : f32 to vector<16x1xf32>
    %288 = arith.addf %284, %287 : vector<16x1xf32>
    %289 = math.rsqrt %288 : vector<16x1xf32>
    %290 = vector.broadcast %289 : vector<16x1xf32> to vector<16x32xf32>
    %291 = arith.mulf %286, %290 : vector<16x32xf32>
    %292 = vector.broadcast %272 : vector<1x32xf32> to vector<16x32xf32>
    %293 = arith.mulf %291, %292 : vector<16x32xf32>
    %294 = vector.broadcast %273 : vector<1x32xf32> to vector<16x32xf32>
    %295 = arith.addf %293, %294 : vector<16x32xf32>
    %c1_95 = arith.constant 1 : index
    %c0_96 = arith.constant 0 : index
    %c256_97 = arith.constant 256 : index
    %296 = vector.load %arg2[%c1_95, %c0_96, %c256_97] : memref<2x64x512xf32, #tpu.memory_space<vmem>>, vector<1x32x64xf32>
    %297 = vector.shape_cast %296 : vector<1x32x64xf32> to vector<32x64xf32>
    %c92 = arith.constant 92 : index
    %c0_98 = arith.constant 0 : index
    %298 = vector.load %arg1[%c92, %c0_98] : memref<104x128xf32, #tpu.memory_space<vmem>>, vector<1x64xf32>
    %cst_99 = arith.constant dense<0.000000e+00> : vector<16x64xf32>
    %299 = tpu.matmul %295, %297, %cst_99 {dimension_numbers = #tpu.dot_dimension_numbers<[1], [0], [0], [1], [0, 0, 1, 1], [], []>} : vector<16x32xf32>, vector<32x64xf32>, vector<16x64xf32> -> vector<16x64xf32>
    %300 = vector.broadcast %298 : vector<1x64xf32> to vector<16x64xf32>
    %301 = arith.addf %299, %300 : vector<16x64xf32>
    %cst_100 = arith.constant 0.000000e+00 : f32
    %302 = vector.broadcast %cst_100 : f32 to vector<16x64xf32>
    %303 = arith.maximumf %301, %302 : vector<16x64xf32>
    %c1_101 = arith.constant 1 : index
    %c0_102 = arith.constant 0 : index
    %c384_103 = arith.constant 384 : index
    %304 = vector.load %arg2[%c1_101, %c0_102, %c384_103] : memref<2x64x512xf32, #tpu.memory_space<vmem>>, vector<1x64x32xf32>
    %305 = vector.shape_cast %304 : vector<1x64x32xf32> to vector<64x32xf32>
    %c93 = arith.constant 93 : index
    %c0_104 = arith.constant 0 : index
    %306 = vector.load %arg1[%c93, %c0_104] : memref<104x128xf32, #tpu.memory_space<vmem>>, vector<1x32xf32>
    %cst_105 = arith.constant dense<0.000000e+00> : vector<16x32xf32>
    %307 = tpu.matmul %303, %305, %cst_105 {dimension_numbers = #tpu.dot_dimension_numbers<[1], [0], [0], [1], [0, 0, 1, 1], [], []>} : vector<16x64xf32>, vector<64x32xf32>, vector<16x32xf32> -> vector<16x32xf32>
    %308 = vector.broadcast %306 : vector<1x32xf32> to vector<16x32xf32>
    %309 = arith.addf %307, %308 : vector<16x32xf32>
    %310 = arith.addf %295, %309 : vector<16x32xf32>
    %c96 = arith.constant 96 : index
    %c0_106 = arith.constant 0 : index
    %311 = vector.load %arg1[%c96, %c0_106] : memref<104x128xf32, #tpu.memory_space<vmem>>, vector<1x32xf32>
    %c97 = arith.constant 97 : index
    %c0_107 = arith.constant 0 : index
    %312 = vector.load %arg1[%c97, %c0_107] : memref<104x128xf32, #tpu.memory_space<vmem>>, vector<1x32xf32>
    %cst_108 = arith.constant dense<0.000000e+00> : vector<16xf32>
    %313 = vector.multi_reduction <add>, %310, %cst_108 [1] : vector<16x32xf32> to vector<16xf32>
    %314 = vector.shape_cast %313 : vector<16xf32> to vector<16x1xf32>
    %cst_109 = arith.constant 3.200000e+01 : f32
    %315 = vector.broadcast %cst_109 : f32 to vector<16x1xf32>
    %316 = arith.divf %314, %315 : vector<16x1xf32>
    %317 = vector.broadcast %316 : vector<16x1xf32> to vector<16x32xf32>
    %318 = arith.subf %310, %317 : vector<16x32xf32>
    %319 = arith.mulf %318, %318 : vector<16x32xf32>
    %cst_110 = arith.constant dense<0.000000e+00> : vector<16xf32>
    %320 = vector.multi_reduction <add>, %319, %cst_110 [1] : vector<16x32xf32> to vector<16xf32>
    %321 = vector.shape_cast %320 : vector<16xf32> to vector<16x1xf32>
    %cst_111 = arith.constant 3.200000e+01 : f32
    %322 = vector.broadcast %cst_111 : f32 to vector<16x1xf32>
    %323 = arith.divf %321, %322 : vector<16x1xf32>
    %324 = vector.broadcast %316 : vector<16x1xf32> to vector<16x32xf32>
    %325 = arith.subf %310, %324 : vector<16x32xf32>
    %cst_112 = arith.constant 9.99999974E-6 : f32
    %326 = vector.broadcast %cst_112 : f32 to vector<16x1xf32>
    %327 = arith.addf %323, %326 : vector<16x1xf32>
    %328 = math.rsqrt %327 : vector<16x1xf32>
    %329 = vector.broadcast %328 : vector<16x1xf32> to vector<16x32xf32>
    %330 = arith.mulf %325, %329 : vector<16x32xf32>
    %331 = vector.broadcast %311 : vector<1x32xf32> to vector<16x32xf32>
    %332 = arith.mulf %330, %331 : vector<16x32xf32>
    %333 = vector.broadcast %312 : vector<1x32xf32> to vector<16x32xf32>
    %334 = arith.addf %332, %333 : vector<16x32xf32>
    %335 = vector.extract_strided_slice %334 {offsets = [7, 0], sizes = [1, 32], strides = [1, 1]} : vector<16x32xf32> to vector<1x32xf32>
    %336 = vector.extract_strided_slice %334 {offsets = [15, 0], sizes = [1, 32], strides = [1, 1]} : vector<16x32xf32> to vector<1x32xf32>
    %337 = tpu.concatenate %335, %336 in 0 : vector<1x32xf32>, vector<1x32xf32> -> vector<2x32xf32>
    %c80 = arith.constant 80 : index
    %c0_113 = arith.constant 0 : index
    %338 = vector.load %arg1[%c80, %c0_113] : memref<104x128xf32, #tpu.memory_space<vmem>>, vector<1x32xf32>
    %c81 = arith.constant 81 : index
    %c0_114 = arith.constant 0 : index
    %339 = vector.load %arg1[%c81, %c0_114] : memref<104x128xf32, #tpu.memory_space<vmem>>, vector<1x32xf32>
    %cst_115 = arith.constant dense<0.000000e+00> : vector<2xf32>
    %340 = vector.multi_reduction <add>, %337, %cst_115 [1] : vector<2x32xf32> to vector<2xf32>
    %341 = vector.shape_cast %340 : vector<2xf32> to vector<2x1xf32>
    %cst_116 = arith.constant 3.200000e+01 : f32
    %342 = vector.broadcast %cst_116 : f32 to vector<2x1xf32>
    %343 = arith.divf %341, %342 : vector<2x1xf32>
    %344 = vector.broadcast %343 : vector<2x1xf32> to vector<2x32xf32>
    %345 = arith.subf %337, %344 : vector<2x32xf32>
    %346 = arith.mulf %345, %345 : vector<2x32xf32>
    %cst_117 = arith.constant dense<0.000000e+00> : vector<2xf32>
    %347 = vector.multi_reduction <add>, %346, %cst_117 [1] : vector<2x32xf32> to vector<2xf32>
    %348 = vector.shape_cast %347 : vector<2xf32> to vector<2x1xf32>
    %cst_118 = arith.constant 3.200000e+01 : f32
    %349 = vector.broadcast %cst_118 : f32 to vector<2x1xf32>
    %350 = arith.divf %348, %349 : vector<2x1xf32>
    %351 = vector.broadcast %343 : vector<2x1xf32> to vector<2x32xf32>
    %352 = arith.subf %337, %351 : vector<2x32xf32>
    %cst_119 = arith.constant 9.99999974E-6 : f32
    %353 = vector.broadcast %cst_119 : f32 to vector<2x1xf32>
    %354 = arith.addf %350, %353 : vector<2x1xf32>
    %355 = math.rsqrt %354 : vector<2x1xf32>
    %356 = vector.broadcast %355 : vector<2x1xf32> to vector<2x32xf32>
    %357 = arith.mulf %352, %356 : vector<2x32xf32>
    %358 = vector.broadcast %338 : vector<1x32xf32> to vector<2x32xf32>
    %359 = arith.mulf %357, %358 : vector<2x32xf32>
    %360 = vector.broadcast %339 : vector<1x32xf32> to vector<2x32xf32>
    %361 = arith.addf %359, %360 : vector<2x32xf32>
    %c32 = arith.constant 32 : index
    %c0_120 = arith.constant 0 : index
    %362 = vector.load %arg1[%c32, %c0_120] : memref<104x128xf32, #tpu.memory_space<vmem>>, vector<32x16xf32>
    %cst_121 = arith.constant dense<0.000000e+00> : vector<2x16xf32>
    %363 = tpu.matmul %361, %362, %cst_121 {dimension_numbers = #tpu.dot_dimension_numbers<[1], [0], [0], [1], [0, 0, 1, 1], [], []>} : vector<2x32xf32>, vector<32x16xf32>, vector<2x16xf32> -> vector<2x16xf32>
    %cst_122 = arith.constant 0.000000e+00 : f32
    %364 = vector.broadcast %cst_122 : f32 to vector<2x16xf32>
    %365 = arith.maximumf %363, %364 : vector<2x16xf32>
    %c64 = arith.constant 64 : index
    %c0_123 = arith.constant 0 : index
    %366 = vector.load %arg1[%c64, %c0_123] : memref<104x128xf32, #tpu.memory_space<vmem>>, vector<16x128xf32>
    %cst_124 = arith.constant dense<0.000000e+00> : vector<2x128xf32>
    %367 = tpu.matmul %365, %366, %cst_124 {dimension_numbers = #tpu.dot_dimension_numbers<[1], [0], [0], [1], [0, 0, 1, 1], [], []>} : vector<2x16xf32>, vector<16x128xf32>, vector<2x128xf32> -> vector<2x128xf32>
    %c0_125 = arith.constant 0 : index
    %c0_126 = arith.constant 0 : index
    %368 = vector.load %arg3[%c0_125, %c0_126] : memref<2x128xf32, #tpu.memory_space<vmem>>, vector<2x128xf32>
    tpu.vector_store %arg3[%c0_125, %c0_126], %367 {strides = array<i32>} : memref<2x128xf32, #tpu.memory_space<vmem>>, vector<2x128xf32>,
    return
  }
}

</mosaic_0001>

<bundles_post_ra>
// kernel: tpu_custom_call.1
= control target key start
LH: loop header
LB: loop body
LE: loop exit
PB: predicated region body
PF: predicated region fallthrough
CT: control target
= control target key end

     0   :  { %8 = vsyncpa [#allocation4], 0  ;;  %s5269_s0 = inlined_call_operand.hbm [shape: f32[16,16], index: 0, kind: input, shape index: {}]   ;;  %s5270_s1 = inlined_call_operand.hbm [shape: f32[104,128], index: 1, kind: input, shape index: {}]   ;;  %s5271_s2 = inlined_call_operand.hbm [shape: f32[2,64,512], index: 2, kind: input, shape index: {}]   ;;  %s5272_s3 = inlined_call_operand.hbm [shape: f32[2,128], index: 3, kind: output, shape index: {}]  }
   0x1   :  { %9 = vsyncpa [#allocation7], 0 }
   0x2   :  { %10 = vsyncpa [#allocation5], 0  ;;  %s4756_s12 = smov [#allocation6]   ;;  %s4757_s14 = smov [#allocation3]  }
   0x3   :  { %s28_s13 = sshll.u32 %s4756_s12, 4  ;;  %s16_s15 = sshll.u32 %s4757_s14, 4  ;;  %s29_s13 = int_to_ptr.vmem [resolvable:$true] %s28_s13  ;;  %s4794_s15 = int_to_ptr.vmem [resolvable:$true] %s16_s15 }
   0x4   :  { %s4662_s18 = scalar_lea.hbm %s5270_s1, 1664 }
   0x5   :  { %p4663_p0 = scmp.ne.s32.totalorder %s5270_s1, %s4662_s18  ;;  %p4666_p1 = scmp.lt.u32.totalorder %s4662_s18, %s5270_s1 }
   0x7   :  { %p4668_p2 = pnand %p4666_p1, %p4663_p0 }
   0x9   :  { %4671 = shalt.err (!%p4668_p2)
}
   0xa   :  { %s4672_s23 = scalar_lea.vmem %s29_s13, 1664  ;;  %p4677_p4 = scmp.lt.s32.totalorder %s29_s13, %s29_s13 }
   0xb   :  { %p4673_p3 = scmp.ne.s32.totalorder %s29_s13, %s4672_s23  ;;  %p4678_p5 = scmp.lt.s32.totalorder %s4672_s23, %s4672_s23 }
   0xd   :  { %p4679_p6 = por %p4678_p5, %p4677_p4 }
   0xf   :  { %p4680_p7 = pnand %p4679_p6, %p4673_p3 }
  0x11   :  { %4683 = shalt.err (!%p4680_p7)
}
  0x12   :  { %s4758_s24 = smov 128   ;;  %s4759_s25 = smov 8  }
  0x13   :  { %34 = dma.hbm_to_vmem [thread:$0]  %s5270_s1, 1664, %s29_s13, [#allocation7], %s4758_s24, %s4758_s24, %s4759_s25  }
  0x14   :  { %s4684_s30 = scalar_lea.hbm %s5269_s0, 256 }
  0x15   :  { %p4685_p8 = scmp.ne.s32.totalorder %s5269_s0, %s4684_s30  ;;  %p4688_p9 = scmp.lt.u32.totalorder %s4684_s30, %s5269_s0 }
  0x17   :  { %p4690_p10 = pnand %p4688_p9, %p4685_p8 }
  0x19   :  { %4693 = shalt.err (!%p4690_p10)
}
  0x1a   :  { %s4694_s8 = scalar_lea.vmem %s4794_s15, 256  ;;  %p4699_p12 = scmp.lt.s32.totalorder %s4794_s15, %s4794_s15 }
  0x1b   :  { %p4695_p11 = scmp.ne.s32.totalorder %s4794_s15, %s4694_s8  ;;  %p4700_p13 = scmp.lt.s32.totalorder %s4694_s8, %s4694_s8 }
  0x1d   :  { %p4701_p0 = por %p4700_p13, %p4699_p12 }
  0x1f   :  { %p4702_p1 = pnand %p4701_p0, %p4695_p11 }
  0x21   :  { %4705 = shalt.err (!%p4702_p1)
}
  0x22   :  { %22 = dma.hbm_to_vmem [thread:$0]  %s5269_s0, 256, %s4794_s15, [#allocation4], %s4758_s24, %s4758_s24, %s4759_s25  }
  0x23   :  { %s4760_s10 = smov [#allocation8]   ;;  %s4706_s14 = scalar_lea.hbm %s5271_s2, 8192 }
  0x24   :  { %s40_s11 = sshll.u32 %s4760_s10, 4  ;;  %p4707_p2 = scmp.ne.s32.totalorder %s5271_s2, %s4706_s14  ;;  %s41_s11 = int_to_ptr.vmem [resolvable:$true] %s40_s11 }
  0x25   :  { %p4710_p3 = scmp.lt.u32.totalorder %s4706_s14, %s5271_s2 }
  0x27   :  { %p4712_p4 = pnand %p4710_p3, %p4707_p2 }
  0x29   :  { %4715 = shalt.err (!%p4712_p4)
}
  0x2a   :  { %s4716_s20 = scalar_lea.vmem %s41_s11, 8192  ;;  %p4721_p6 = scmp.lt.s32.totalorder %s41_s11, %s41_s11 }
  0x2b   :  { %p4717_p5 = scmp.ne.s32.totalorder %s41_s11, %s4716_s20  ;;  %p4722_p7 = scmp.lt.s32.totalorder %s4716_s20, %s4716_s20 }
  0x2d   :  { %p4723_p8 = por %p4722_p7, %p4721_p6 }
  0x2f   :  { %p4724_p9 = pnand %p4723_p8, %p4717_p5 }
  0x31   :  { %4727 = shalt.err (!%p4724_p9)
}
  0x32   :  { %s4761_s0 = smov 512   ;;  %s4762_s15 = smov 32  }
  0x33   :  { %46 = dma.hbm_to_vmem [thread:$0]  %s5271_s2, 8192, %s41_s11, [#allocation7], %s4761_s0, %s4761_s0, %s4762_s15  }
  0x34   :  { %4750 = dma.done.wait [#allocation4], 256  }
  0x35   :  { %4751 = vsyncadd [#allocation4], 4294967040 }
  0x36   :  { %4752 = dma.done.wait [#allocation7], 9856  }
  0x37   :  { %4753 = vsyncadd [#allocation7], 4294957440  ;;  %vm62_vm0 = vcmask 130048   ;;  %v58_v0 = vld [vmem:[#allocation6 + $0x10] sm:$0xff]  ;;  %v59_v1 = vld [vmem:[#allocation6 + $0x18] sm:$0xff]  ;;  %vm155_vm1 = vcmask 261120  }
  0x38   :  { %v60_v2 = vld [vmem:[#allocation3] sm:$0xff]  ;;  %v4469_v3 = vpack.c.bf16 %v59_v1, %v58_v0  ;;  %v146_v4 = vld [vmem:[#allocation8] sm:$0xff]  ;;  %v61_v7 = vld [vmem:[#allocation3 + $0x8] sm:$0xff]  ;;  %v4763_v21 = vmov 0.0   ;;  %s4764_s2 = smov 104   ;;  %s4765_s23 = smov 120  }
  0x39   :  { %4184 = vmatprep.mubr.msk.f32.mxu0 %vm62_vm0, %v60_v2  ;;  %v147_v5 = vld [vmem:[#allocation8 + $0x20] sm:$0xff]  ;;  %v56_v12 = vld [vmem:[#allocation6] sm:$0xff]  ;;  %v3964_v19 = vld [vmem:[#allocation6 + $0x52] ss:$0 sm:$0xff]  ;;  %vm4766_vm2 = vmmov 0   ;;  %s4767_s24 = smov 112  }
  0x3a   :  { %v4473_v6 = vpack.c.bf16 %v147_v5, %v146_v4  ;;  %4470 = vmatprep.subr.bf16.mxu0 %v4469_v3  ;;  %v148_v8 = vld [vmem:[#allocation8 + $0x40] sm:$0xff]  ;;  %s4768_s26 = smov 96   ;;  %vm253_vm3 = vcmask 64512   ;;  %s4769_s27 = smov 64   ;;  %vm1561_vm4 = vcmask 130112   ;;  %vm1567_vm5 = vcmask 195712  }
  0x3b   :  { %4472 = vmatpush3.bf16.msra.mxu0 %v4469_v3  ;;  %v149_v9 = vld [vmem:[#allocation8 + $0x60] sm:$0xff]  ;;  %s4770_s28 = smov 16   ;;  %s4771_s29 = smov 24   ;;  %vm1573_vm6 = vcmask 261312   ;;  %vm1831_vm7 = vcmask 523264   ;;  %vm3764_vm8 = vcmask 1040384  }
  0x3c   :  { %4474 = vmatprep.subr.bf16.mxu1 %v4473_v6  ;;  %v4477_v10 = vpack.c.bf16 %v149_v9, %v148_v8  ;;  %v57_v11 = vld [vmem:[#allocation6 + $0x8] sm:$0xff]  ;;  %4198 = vmatprep.subr.mxu0 %v4763_v21  ;;  %vm3768_vm9 = vcmask 254976  }
  0x3d   :  { %4476 = vmatpush3.bf16.msra.mxu1 %v4473_v6 }
  0x3e   :  { %4185 = vmatmul.mubr.msk.f32.vlgmr.msra.gmra.mrb[0].mxu0 %vm62_vm0, %v61_v7  ;;  %4478 = vmatprep.subr.bf16.mxu1 %v4477_v10 }
  0x3f   :  { %4200 = vmatprep.mubr.msk.f32.mxu0 %vm4766_vm2, %v4763_v21 }
  0x41   :  { %4480 = vmatpush3.bf16.msra.mxu1 %v4477_v10 }
  0x42   :  { %4208 = vmatprep.subr.mxu1 %v4763_v21 }
 0x111   :  { %v4186_v13 = vpop.f32.mrb[0].mxu0 }
 0x112   :  { %v4841_v14 = vadd.f32 %v4186_v13, %v57_v11  ;;  %v135_v15 = vpop.f32.mrb[1].mxu0 }
 0x113   :  { %v4843_v16 = vadd.f32 %v135_v15, %v56_v12 }
 0x114   :  { %v145_v18 = vmax.f32 %v4841_v14, 0.0 }
 0x115   :  { %v144_v17 = vmax.f32 %v4843_v16, 0.0 }
 0x117   :  { %4195 = vmatprep.mubr.msk.f32.mxu1 %vm155_vm1, %v144_v17 }
 0x118   :  { %4196 = vmatmul.mubr.msk.f32.vlgmr.msra.gmra.mrb[0].mxu1 %vm155_vm1, %v145_v18 }
 0x119   :  { %4210 = vmatprep.mubr.msk.f32.mxu1 %vm4766_vm2, %v4763_v21 }
 0x1eb   :  { %v4197_v20 = vpop.f32.mrb[0].mxu1 }
 0x1ec   :  { %v228_v22 = vpop.f32.mrb[1].mxu1  ;;  %v4865_v24 = vadd.f32 %v4197_v20, %v3964_v19 }
 0x1ed   :  { %v4855_v23 = vadd.f32 %v3964_v19, %v228_v22 }
 0x1ef   :  { %242 = vrot.lane.b32.xlu1 %v4855_v23, %s4764_s2  ;;  %238 = vrot.lane.b32.xlu0 %v4855_v23, %s4765_s23 }
 0x1f3   :  { %245 = vrot.lane.b32.xlu1 %v4865_v24, %s4765_s23  ;;  %240 = vrot.lane.b32.xlu0 %v4855_v23, %s4767_s24 }
 0x1f7   :  { %249 = vrot.lane.b32.xlu1 %v4865_v24, %s4764_s2  ;;  %247 = vrot.lane.b32.xlu0 %v4865_v24, %s4767_s24 }
 0x1fb   :  { %251 = vrot.lane.b32.xlu0 %v4855_v23, %s4768_s26 }
 0x261   :  { %v4877_v25 = vpop.permute.xlu1 %242  ;;  %v4879_v26 = vpop.permute.xlu0 %238 }
 0x262   :  { %328 = vrot.lane.b32.xlu1 %v4879_v26, %s4768_s26 }
 0x265   :  { %v4883_v27 = vpop.permute.xlu0 %240  ;;  %v4889_v28 = vpop.permute.xlu1 %245 }
 0x266   :  { %480 = vrot.lane.b32.xlu1 %v4877_v25, %s4768_s26  ;;  %404 = vrot.lane.b32.xlu0 %v4883_v27, %s4768_s26 }
 0x269   :  { %v4891_v29 = vpop.permute.xlu0 %247  ;;  %v4897_v30 = vpop.permute.xlu1 %249 }
 0x26a   :  { %632 = vrot.lane.b32.xlu1 %v4889_v28, %s4768_s26  ;;  %556 = vrot.lane.b32.xlu0 %v4865_v24, %s4768_s26 }
 0x26d   :  { %v252_v31 = vpop.permute.xlu0 %251 }
 0x26e   :  { %784 = vrot.lane.b32.xlu1 %v4897_v30, %s4768_s26  ;;  %708 = vrot.lane.b32.xlu0 %v4891_v29, %s4768_s26 }
 0x26f   :  { %4199 = vmatpush3.xpose.msk.msra.mxu0 %vm253_vm3, %v252_v31 }
 0x270   :  { %4203 = vmatprep.subr.mxu0 %v4763_v21 }
 0x272   :  { %4201 = vmatmul.mubr.msk.f32.vlgmr.msra.gmra.mrb[2].mxu0 %vm253_vm3, %v4855_v23 }
 0x273   :  { %4205 = vmatprep.mubr.msk.f32.mxu0 %vm4766_vm2, %v4763_v21 }
 0x2d4   :  { %v329_v32 = vpop.permute.xlu1 %328 }
 0x2d5   :  { %4204 = vmatpush3.xpose.msk.msra.mxu0 %vm253_vm3, %v329_v32 }
 0x2d6   :  { %4213 = vmatprep.subr.mxu0 %v4763_v21 }
 0x2d8   :  { %v481_v33 = vpop.permute.xlu1 %480  ;;  %4206 = vmatmul.mubr.msk.f32.vlgmr.msra.gmra.mrb[4].mxu0 %vm253_vm3, %v4879_v26  ;;  %v405_v34 = vpop.permute.xlu0 %404 }
 0x2d9   :  { %4209 = vmatpush3.xpose.msk.msra.mxu1 %vm253_vm3, %v405_v34  ;;  %4214 = vmatpush3.xpose.msk.msra.mxu0 %vm253_vm3, %v481_v33 }
 0x2da   :  { %4215 = vmatprep.mubr.msk.f32.mxu0 %vm4766_vm2, %v4763_v21  ;;  %4218 = vmatprep.subr.mxu1 %v4763_v21 }
 0x2db   :  { %4223 = vmatprep.subr.mxu0 %v4763_v21 }
 0x2dc   :  { %v633_v35 = vpop.permute.xlu1 %632  ;;  %4211 = vmatmul.mubr.msk.f32.vlgmr.msra.gmra.mrb[2].mxu1 %vm253_vm3, %v4883_v27  ;;  %4216 = vmatmul.mubr.msk.f32.vlgmr.msra.gmra.mrb[6].mxu0 %vm253_vm3, %v4877_v25  ;;  %v557_v36 = vpop.permute.xlu0 %556 }
 0x2dd   :  { %4219 = vmatpush3.xpose.msk.msra.mxu1 %vm253_vm3, %v557_v36  ;;  %4224 = vmatpush3.xpose.msk.msra.mxu0 %vm253_vm3, %v633_v35 }
 0x2de   :  { %4220 = vmatprep.mubr.msk.f32.mxu1 %vm4766_vm2, %v4763_v21  ;;  %4225 = vmatprep.mubr.msk.f32.mxu0 %vm4766_vm2, %v4763_v21 }
 0x2df   :  { %4228 = vmatprep.subr.mxu1 %v4763_v21  ;;  %4233 = vmatprep.subr.mxu0 %v4763_v21 }
 0x2e0   :  { %v785_v37 = vpop.permute.xlu1 %784  ;;  %4221 = vmatmul.mubr.msk.f32.vlgmr.msra.gmra.mrb[4].mxu1 %vm253_vm3, %v4865_v24  ;;  %4226 = vmatmul.mubr.msk.f32.vlgmr.msra.gmra.mrb[8].mxu0 %vm253_vm3, %v4889_v28  ;;  %v709_v38 = vpop.permute.xlu0 %708 }
 0x2e1   :  { %4229 = vmatpush3.xpose.msk.msra.mxu1 %vm253_vm3, %v709_v38  ;;  %4234 = vmatpush3.xpose.msk.msra.mxu0 %vm253_vm3, %v785_v37 }
 0x2e2   :  { %4230 = vmatprep.mubr.msk.f32.mxu1 %vm4766_vm2, %v4763_v21  ;;  %4235 = vmatprep.mubr.msk.f32.mxu0 %vm4766_vm2, %v4763_v21 }
 0x2e3   :  { %4238 = vmatprep.subr.mxu1 %v4763_v21  ;;  %4243 = vmatprep.subr.mxu0 %v4763_v21 }
 0x2e4   :  { %4231 = vmatmul.mubr.msk.f32.vlgmr.msra.gmra.mrb[6].mxu1 %vm253_vm3, %v4891_v29  ;;  %4236 = vmatmul.mubr.msk.f32.vlgmr.msra.gmra.mrb[10].mxu0 %vm253_vm3, %v4897_v30 }
 0x2e5   :  { %4240 = vmatprep.mubr.msk.f32.mxu1 %vm4766_vm2, %v4763_v21  ;;  %4245 = vmatprep.mubr.msk.f32.mxu0 %vm4766_vm2, %v4763_v21 }
 0x345   :  { %v324_v39 = vpop.f32.mrb[2].mxu0 }
 0x346   :  { %v4202_v40 = vpop.f32.mrb[3].mxu0  ;;  %v860_v41 = vsel %vm253_vm3, %v324_v39, -inf }
 0x347   :  { %861 = vmax.xlane.f32.xlu0 %v860_v41 }
 0x3ab   :  { %v400_v42 = vpop.f32.mrb[4].mxu0 }
 0x3ac   :  { %v4207_v43 = vpop.f32.mrb[5].mxu0  ;;  %v863_v44 = vsel %vm253_vm3, %v400_v42, -inf }
 0x3ad   :  { %864 = vmax.xlane.f32.xlu1 %v863_v44 }
 0x3af   :  { %v476_v45 = vpop.f32.mrb[2].mxu1  ;;  %v552_v46 = vpop.f32.mrb[6].mxu0 }
 0x3b0   :  { %v4212_v47 = vpop.f32.mrb[3].mxu1  ;;  %v4217_v48 = vpop.f32.mrb[7].mxu0  ;;  %v866_v49 = vsel %vm253_vm3, %v476_v45, -inf  ;;  %v869_v54 = vsel %vm253_vm3, %v552_v46, -inf }
 0x3b1   :  { %867 = vmax.xlane.f32.xlu0 %v866_v49 }
 0x3b3   :  { %v628_v50 = vpop.f32.mrb[4].mxu1  ;;  %v704_v51 = vpop.f32.mrb[8].mxu0 }
 0x3b4   :  { %v4222_v52 = vpop.f32.mrb[5].mxu1  ;;  %v4227_v53 = vpop.f32.mrb[9].mxu0  ;;  %v872_v55 = vsel %vm253_vm3, %v628_v50, -inf  ;;  %v875_v60 = vsel %vm253_vm3, %v704_v51, -inf }
 0x3b5   :  { %870 = vmax.xlane.f32.xlu0 %v869_v54  ;;  %873 = vmax.xlane.f32.xlu1 %v872_v55 }
 0x3b7   :  { %v780_v56 = vpop.f32.mrb[6].mxu1  ;;  %v856_v57 = vpop.f32.mrb[10].mxu0 }
 0x3b8   :  { %v4232_v58 = vpop.f32.mrb[7].mxu1  ;;  %v4237_v59 = vpop.f32.mrb[11].mxu0  ;;  %v878_v61 = vsel %vm253_vm3, %v780_v56, -inf  ;;  %v881_v62 = vsel %vm253_vm3, %v856_v57, -inf }
 0x3b9   :  { %876 = vmax.xlane.f32.xlu0 %v875_v60  ;;  %879 = vmax.xlane.f32.xlu1 %v878_v61 }
 0x3bd   :  { %882 = vmax.xlane.f32.xlu0 %v881_v62 }
 0x3ca   :  { %948 = vrot.lane.b32.xlu1 %v4855_v23, %s4769_s27 }
 0x3ce   :  { %1100 = vrot.lane.b32.xlu1 %v4883_v27, %s4769_s27 }
 0x3d2   :  { %1176 = vrot.lane.b32.xlu1 %v4877_v25, %s4769_s27 }
 0x3d3   :  { %1024 = vrot.lane.b32.xlu0 %v4879_v26, %s4769_s27 }
 0x3d4   :  { %v862_v63 = vpop.xlane.xlu0 %861 }
 0x3d5   :  { %v884_v0 = vsub.f32 %v324_v39, %v862_v63 }
 0x3d6   :  { %1328 = vrot.lane.b32.xlu1 %v4889_v28, %s4769_s27 }
 0x3d7   :  { %1252 = vrot.lane.b32.xlu0 %v4865_v24, %s4769_s27  ;;  %v892_v1 = vmul.f32 1.442695, %v884_v0 }
 0x3d9   :  { %4580 = vpow2.f32 %v892_v1 }
 0x3e3   :  { %v4971_v2 = vpop.eup %4580 }
 0x3e4   :  { %v908_v3 = vsel %vm253_vm3, %v4971_v2, 0.0 }
 0x3fa   :  { %909 = vadd.xlane.f32.xlu1 %v908_v3 }
 0x43a   :  { %v865_v4 = vpop.xlane.xlu1 %864 }
 0x43b   :  { %v885_v5 = vsub.f32 %v400_v42, %v865_v4 }
 0x43d   :  { %v894_v6 = vmul.f32 1.442695, %v885_v5 }
 0x43e   :  { %v868_v7 = vpop.xlane.xlu0 %867 }
 0x43f   :  { %4582 = vpow2.f32 %v894_v6  ;;  %v886_v8 = vsub.f32 %v476_v45, %v868_v7 }
 0x441   :  { %v896_v9 = vmul.f32 1.442695, %v886_v8 }
 0x442   :  { %v874_v10 = vpop.xlane.xlu1 %873  ;;  %v871_v11 = vpop.xlane.xlu0 %870 }
 0x443   :  { %4584 = vpow2.f32 %v896_v9  ;;  %v888_v12 = vsub.f32 %v628_v50, %v874_v10  ;;  %v887_v13 = vsub.f32 %v552_v46, %v871_v11 }
 0x445   :  { %v900_v15 = vmul.f32 1.442695, %v888_v12  ;;  %v898_v19 = vmul.f32 1.442695, %v887_v13 }
 0x446   :  { %v880_v20 = vpop.xlane.xlu1 %879  ;;  %v877_v22 = vpop.xlane.xlu0 %876 }
 0x447   :  { %4586 = vpow2.f32 %v900_v15  ;;  %v890_v23 = vsub.f32 %v780_v56, %v880_v20  ;;  %v889_v24 = vsub.f32 %v704_v51, %v877_v22  ;;  %v1593_v22 = vld [vmem:[#allocation8 + $0x8] sm:$0xff] }
 0x448   :  { %4588 = vpow2.f32 %v898_v19 }
 0x449   :  { %v4583_v25 = vpop.eup %4582  ;;  %v904_v26 = vmul.f32 1.442695, %v890_v23  ;;  %v902_v27 = vmul.f32 1.442695, %v889_v24  ;;  %v1594_v23 = vld [vmem:[#allocation8 + $0x28] sm:$0xff] }
 0x44a   :  { %v949_v28 = vpop.permute.xlu1 %948  ;;  %v883_v31 = vpop.xlane.xlu0 %882  ;;  %v911_v32 = vsel %vm253_vm3, %v4583_v25, 0.0 }
 0x44b   :  { %4590 = vpow2.f32 %v904_v26  ;;  %v891_v33 = vsub.f32 %v856_v57, %v883_v31  ;;  %912 = vadd.xlane.f32.xlu0 %v911_v32  ;;  %4239 = vmatpush3.msra.mxu1 %v949_v28  ;;  %v1595_v26 = vld [vmem:[#allocation8 + $0x48] sm:$0xff] }
 0x44c   :  { %4592 = vpow2.f32 %v902_v27  ;;  %4248 = vmatprep.subr.mxu1 %v4763_v21  ;;  %v1596_v27 = vld [vmem:[#allocation8 + $0x68] sm:$0xff] }
 0x44d   :  { %v4585_v34 = vpop.eup %4584  ;;  %v906_v35 = vmul.f32 1.442695, %v891_v33  ;;  %v4485_v28 = vpack.c.bf16 %v1596_v27, %v1595_v26  ;;  %v3995_v27 = vld [vmem:[#allocation6 + $0x57] ss:$0 sm:$0xff] }
 0x44e   :  { %v1025_v36 = vpop.permute.xlu0 %1024  ;;  %v914_v37 = vsel %vm253_vm3, %v4585_v34, 0.0  ;;  %v1101_v48 = vpop.permute.xlu1 %1100 }
 0x44f   :  { %4594 = vpow2.f32 %v906_v35  ;;  %915 = vadd.xlane.f32.xlu1 %v914_v37  ;;  %4244 = vmatpush3.msra.mxu0 %v1025_v36 }
 0x450   :  { %4253 = vmatprep.subr.mxu0 %v4763_v21 }
 0x451   :  { %v4587_v38 = vpop.eup %4586 }
 0x452   :  { %v4589_v39 = vpop.eup %4588  ;;  %v920_v40 = vsel %vm253_vm3, %v4587_v38, 0.0  ;;  %v1177_v49 = vpop.permute.xlu1 %1176 }
 0x453   :  { %921 = vadd.xlane.f32.xlu1 %v920_v40  ;;  %v917_v41 = vsel %vm253_vm3, %v4589_v39, 0.0 }
 0x454   :  { %918 = vadd.xlane.f32.xlu0 %v917_v41 }
 0x455   :  { %v4591_v42 = vpop.eup %4590 }
 0x456   :  { %v4593_v43 = vpop.eup %4592  ;;  %v926_v44 = vsel %vm253_vm3, %v4591_v42, 0.0  ;;  %v1329_v50 = vpop.permute.xlu1 %1328 }
 0x457   :  { %927 = vadd.xlane.f32.xlu1 %v926_v44  ;;  %v923_v45 = vsel %vm253_vm3, %v4593_v43, 0.0 }
 0x458   :  { %924 = vadd.xlane.f32.xlu0 %v923_v45 }
 0x459   :  { %v4983_v46 = vpop.eup %4594 }
 0x45a   :  { %v929_v47 = vsel %vm253_vm3, %v4983_v46, 0.0 }
 0x45c   :  { %930 = vadd.xlane.f32.xlu0 %v929_v47 }
 0x468   :  { %1480 = vrot.lane.b32.xlu1 %v4897_v30, %s4769_s27  ;;  %v1253_v30 = vpop.permute.xlu0 %1252 }
 0x472   :  { %1404 = vrot.lane.b32.xlu0 %v4891_v29, %s4769_s27 }
 0x487   :  { %v910_v51 = vpop.xlane.xlu1 %909 }
 0x488   :  { %4596 = vrcp.f32 %v910_v51 }
 0x492   :  { %v4597_v52 = vpop.eup %4596 }
 0x493   :  { %v940_v53 = vmul.f32 %v4597_v52, %v4971_v2 }
 0x495   :  { %4241 = vmatmul.mubr.msk.f32.vlgmr.msra.gmra.mrb[8].mxu1 %vm253_vm3, %v940_v53 }
 0x496   :  { %4249 = vmatpush3.msra.mxu1 %v1101_v48  ;;  %4250 = vmatprep.mubr.msk.f32.mxu1 %vm4766_vm2, %v4763_v21 }
 0x497   :  { %4258 = vmatprep.subr.mxu1 %v4763_v21 }
 0x4d8   :  { %v913_v54 = vpop.xlane.xlu0 %912 }
 0x4d9   :  { %4598 = vrcp.f32 %v913_v54 }
 0x4dc   :  { %v916_v29 = vpop.xlane.xlu1 %915 }
 0x4dd   :  { %4600 = vrcp.f32 %v916_v29 }
 0x4e0   :  { %v922_v55 = vpop.xlane.xlu1 %921 }
 0x4e1   :  { %4602 = vrcp.f32 %v922_v55  ;;  %v919_v56 = vpop.xlane.xlu0 %918 }
 0x4e2   :  { %4604 = vrcp.f32 %v919_v56 }
 0x4e3   :  { %v4599_v57 = vpop.eup %4598 }
 0x4e4   :  { %v941_v58 = vmul.f32 %v4599_v57, %v4583_v25  ;;  %v928_v59 = vpop.xlane.xlu1 %927  ;;  %v4481_v25 = vpack.c.bf16 %v1594_v23, %v1593_v22 }
 0x4e5   :  { %4606 = vrcp.f32 %v928_v59  ;;  %v925_v60 = vpop.xlane.xlu0 %924 }
 0x4e6   :  { %4608 = vrcp.f32 %v925_v60  ;;  %4246 = vmatmul.mubr.msk.f32.vlgmr.msra.gmra.mrb[12].mxu0 %vm253_vm3, %v941_v58 }
 0x4e7   :  { %v4601_v61 = vpop.eup %4600  ;;  %4254 = vmatpush3.msra.mxu0 %v1177_v49  ;;  %4255 = vmatprep.mubr.msk.f32.mxu0 %vm4766_vm2, %v4763_v21  ;;  %v3991_v49 = vld [vmem:[#allocation6 + $0x53] ss:$0 sm:$0xff] }
 0x4e8   :  { %v942_v62 = vmul.f32 %v4601_v61, %v4585_v34  ;;  %4263 = vmatprep.subr.mxu0 %v4763_v21  ;;  %v1481_v9 = vpop.permute.xlu1 %1480 }
 0x4e9   :  { %v931_v63 = vpop.xlane.xlu0 %930 }
 0x4ea   :  { %4610 = vrcp.f32 %v931_v63  ;;  %4251 = vmatmul.mubr.msk.f32.vlgmr.msra.gmra.mrb[10].mxu1 %vm253_vm3, %v942_v62 }
 0x4eb   :  { %v4603_v0 = vpop.eup %4602  ;;  %4259 = vmatpush3.msra.mxu1 %v1253_v30  ;;  %4260 = vmatprep.mubr.msk.f32.mxu1 %vm4766_vm2, %v4763_v21 }
 0x4ec   :  { %v4605_v1 = vpop.eup %4604  ;;  %v944_v2 = vmul.f32 %v4603_v0, %v4587_v38  ;;  %4268 = vmatprep.subr.mxu1 %v4763_v21 }
 0x4ed   :  { %v943_v3 = vmul.f32 %v4605_v1, %v4589_v39  ;;  %v1405_v4 = vpop.permute.xlu0 %1404  ;;  %v1728_v1 = vld [vmem:[#allocation8 + $0x50] sm:$0xff] }
 0x4ee   :  { %4261 = vmatmul.mubr.msk.f32.vlgmr.msra.gmra.mrb[12].mxu1 %vm253_vm3, %v944_v2  ;;  %v1729_v2 = vld [vmem:[#allocation8 + $0x70] sm:$0xff] }
 0x4ef   :  { %v4607_v5 = vpop.eup %4606  ;;  %4256 = vmatmul.mubr.msk.f32.vlgmr.msra.gmra.mrb[14].mxu0 %vm253_vm3, %v943_v3  ;;  %4269 = vmatpush3.msra.mxu1 %v1405_v4  ;;  %v4493_v3 = vpack.c.bf16 %v1729_v2, %v1728_v1  ;;  %v1818_v4 = vld [vmem:[#allocation8 + $0x18] sm:$0xff] }
 0x4f0   :  { %v4609_v6 = vpop.eup %4608  ;;  %v946_v7 = vmul.f32 %v4607_v5, %v4591_v42  ;;  %4264 = vmatpush3.msra.mxu0 %v1329_v50  ;;  %4265 = vmatprep.mubr.msk.f32.mxu0 %vm4766_vm2, %v4763_v21  ;;  %v1819_v5 = vld [vmem:[#allocation8 + $0x38] sm:$0xff] }
 0x4f1   :  { %v945_v8 = vmul.f32 %v4609_v6, %v4593_v43  ;;  %4270 = vmatprep.mubr.msk.f32.mxu1 %vm4766_vm2, %v4763_v21  ;;  %4273 = vmatprep.subr.mxu0 %v4763_v21  ;;  %v1820_v6 = vld [vmem:[#allocation8 + $0x58] sm:$0xff] }
 0x4f2   :  { %4271 = vmatmul.mubr.msk.f32.vlgmr.msra.gmra.mrb[14].mxu1 %vm253_vm3, %v946_v7  ;;  %4482 = vmatprep.subr.bf16.mxu1 %v4481_v25  ;;  %v4497_v7 = vpack.c.bf16 %v1819_v5, %v1818_v4 }
 0x4f3   :  { %4266 = vmatmul.mubr.msk.f32.vlgmr.msra.gmra.mrb[16].mxu0 %vm253_vm3, %v945_v8  ;;  %4484 = vmatpush3.bf16.msra.mxu1 %v4481_v25  ;;  %v1821_v8 = vld [vmem:[#allocation8 + $0x78] sm:$0xff]  ;;  %v3994_v25 = vld [vmem:[#allocation6 + $0x56] ss:$0 sm:$0xff] }
 0x4f4   :  { %v4611_v10 = vpop.eup %4610  ;;  %4274 = vmatpush3.msra.mxu0 %v1481_v9  ;;  %4275 = vmatprep.mubr.msk.f32.mxu0 %vm4766_vm2, %v4763_v21  ;;  %v4501_v9 = vpack.c.bf16 %v1821_v8, %v1820_v6  ;;  %v4002_v8 = vld [vmem:[#allocation6 + $0x58] ss:$0 sm:$0xff] }
 0x4f5   :  { %v947_v11 = vmul.f32 %v4611_v10, %v4983_v46  ;;  %4486 = vmatprep.subr.bf16.mxu1 %v4485_v28  ;;  %v1822_v10 = vld [vmem:[#allocation8 + $0x98] sm:$0xff] }
 0x4f7   :  { %4276 = vmatmul.mubr.msk.f32.vlgmr.msra.gmra.mrb[18].mxu0 %vm253_vm3, %v947_v11  ;;  %4488 = vmatpush3.bf16.msra.mxu1 %v4485_v28  ;;  %v1823_v11 = vld [vmem:[#allocation8 + $0xb8] sm:$0xff] }
 0x4f8   :  { %4498 = vmatprep.subr.bf16.mxu1 %v4497_v7 }
 0x568   :  { %v1020_v12 = vpop.f32.mrb[8].mxu1 }
 0x569   :  { %1556 = vst.msk [vmem:[#allocation2] sm:$0xff] %vm253_vm3, %v1020_v12  ;;  %v4242_v13 = vpop.f32.mrb[9].mxu1  ;;  %v4505_v12 = vpack.c.bf16 %v1823_v11, %v1822_v10 }
 0x5b9   :  { %v1096_v15 = vpop.f32.mrb[12].mxu0 }
 0x5ba   :  { %1558 = vrot.lane.b32.xlu0 %v1096_v15, %s4759_s25  ;;  %v4247_v19 = vpop.f32.mrb[13].mxu0 }
 0x5bd   :  { %v1172_v20 = vpop.f32.mrb[10].mxu1 }
 0x5be   :  { %1564 = vrot.lane.b32.xlu1 %v1172_v20, %s4770_s28  ;;  %v4252_v24 = vpop.f32.mrb[11].mxu1 }
 0x5c1   :  { %v1324_v31 = vpop.f32.mrb[12].mxu1 }
 0x5c2   :  { %v1248_v32 = vpop.f32.mrb[14].mxu0  ;;  %1575 = vst.msk [vmem:[#allocation2 + $0x8] sm:$0xff] %vm253_vm3, %v1324_v31  ;;  %v4262_v33 = vpop.f32.mrb[13].mxu1 }
 0x5c3   :  { %1570 = vrot.lane.b32.xlu1 %v1248_v32, %s4771_s29  ;;  %v4257_v34 = vpop.f32.mrb[15].mxu0 }
 0x5c5   :  { %v1476_v35 = vpop.f32.mrb[14].mxu1 }
 0x5c6   :  { %v1400_v36 = vpop.f32.mrb[16].mxu0  ;;  %v4272_v37 = vpop.f32.mrb[15].mxu1 }
 0x5c7   :  { %1577 = vrot.lane.b32.xlu0 %v1400_v36, %s4759_s25  ;;  %v4267_v38 = vpop.f32.mrb[17].mxu0  ;;  %v1824_v36 = vld [vmem:[#allocation8 + $0xd8] sm:$0xff] }
 0x5c8   :  { %v1825_v37 = vld [vmem:[#allocation8 + $0xf8] sm:$0xff] }
 0x5c9   :  { %v4509_v38 = vpack.c.bf16 %v1825_v37, %v1824_v36 }
 0x5ca   :  { %v1552_v39 = vpop.f32.mrb[18].mxu0 }
 0x5cb   :  { %1587 = vrot.lane.b32.xlu1 %v1552_v39, %s4771_s29  ;;  %v4277_v40 = vpop.f32.mrb[19].mxu0  ;;  %1582 = vrot.lane.b32.xlu0 %v1476_v35, %s4770_s28  ;;  %v3996_v39 = vld [vmem:[#allocation6 + $0x54] ss:$0 sm:$0xff] }
 0x62c   :  { %v1559_v41 = vpop.permute.xlu0 %1558 }
 0x62d   :  { %1562 = vst.msk [vmem:[#allocation2] sm:$0xff] %vm1561_vm4, %v1559_v41 }
 0x630   :  { %v1565_v42 = vpop.permute.xlu1 %1564 }
 0x631   :  { %1568 = vst.msk [vmem:[#allocation2] sm:$0xff] %vm1567_vm5, %v1565_v42 }
 0x635   :  { %v1571_v43 = vpop.permute.xlu1 %1570 }
 0x636   :  { %1574 = vst.msk [vmem:[#allocation2] sm:$0xff] %vm1573_vm6, %v1571_v43 }
 0x639   :  { %v1578_v44 = vpop.permute.xlu0 %1577 }
 0x63a   :  { %1580 = vst.msk [vmem:[#allocation2 + $0x8] sm:$0xff] %vm1561_vm4, %v1578_v44 }
 0x63d   :  { %v1588_v45 = vpop.permute.xlu1 %1587  ;;  %v1583_v46 = vpop.permute.xlu0 %1582  ;;  %v1591_v47 = vld [vmem:[#allocation2] sm:$0xff] }
 0x63e   :  { %1585 = vst.msk [vmem:[#allocation2 + $0x8] sm:$0xff] %vm1567_vm5, %v1583_v46  ;;  %4286 = vmatprep.mubr.msk.f32.mxu1 %vm155_vm1, %v1591_v47  ;;  %v3999_v46 = vld [vmem:[#allocation6 + $0x55] ss:$0 sm:$0xff] }
 0x63f   :  { %1590 = vst.msk [vmem:[#allocation2 + $0x8] sm:$0xff] %vm1573_vm6, %v1588_v45 }
 0x646   :  { %v1592_v48 = vld [vmem:[#allocation2 + $0x8] sm:$0xff] }
 0x647   :  { %4287 = vmatmul.mubr.msk.f32.vlgmr.msra.gmra.mrb[16].mxu1 %vm155_vm1, %v1592_v48 }
 0x648   :  { %4500 = vmatpush3.bf16.msra.mxu1 %v4497_v7 }
 0x649   :  { %4502 = vmatprep.subr.bf16.mxu1 %v4501_v9 }
 0x64c   :  { %4504 = vmatpush3.bf16.msra.mxu1 %v4501_v9 }
 0x64d   :  { %4506 = vmatprep.subr.bf16.mxu1 %v4505_v12 }
 0x650   :  { %4508 = vmatpush3.bf16.msra.mxu1 %v4505_v12  ;;  %v4003_v12 = vld [vmem:[#allocation6 + $0x59] ss:$0 sm:$0xff] }
 0x651   :  { %4510 = vmatprep.subr.bf16.mxu1 %v4509_v38 }
 0x654   :  { %4512 = vmatpush3.bf16.msra.mxu1 %v4509_v38 }
 0x655   :  { %4340 = vmatprep.subr.mxu1 %v4763_v21 }
 0x71a   :  { %v4288_v50 = vpop.f32.mrb[16].mxu1 }
 0x71b   :  { %v1680_v51 = vadd.f32 %v4288_v50, %v3991_v49  ;;  %v1674_v52 = vpop.f32.mrb[17].mxu1 }
 0x71c   :  { %v1675_v53 = vadd.f32 %v3991_v49, %v1674_v52 }
 0x71d   :  { %v1684_v30 = vadd.f32 %v1680_v51, %v145_v18  ;;  %v1727_v18 = vld [vmem:[#allocation8 + $0x30] sm:$0xff] }
 0x71e   :  { %v1683_v54 = vadd.f32 %v1675_v53, %v144_v17  ;;  %v1726_v17 = vld [vmem:[#allocation8 + $0x10] sm:$0xff] }
 0x71f   :  { %v1690_v29 = vsel %vm155_vm1, %v1684_v30, 0.0  ;;  %v4489_v0 = vpack.c.bf16 %v1727_v18, %v1726_v17  ;;  %v1958_v17 = vld [vmem:[#allocation8 + $0x140] sm:$0xff] }
 0x720   :  { %1691 = vadd.xlane.f32.xlu1 %v1690_v29  ;;  %v1687_v55 = vsel %vm155_vm1, %v1683_v54, 0.0  ;;  %v1959_v18 = vld [vmem:[#allocation8 + $0x160] sm:$0xff] }
 0x721   :  { %1688 = vadd.xlane.f32.xlu0 %v1687_v55  ;;  %4490 = vmatprep.subr.bf16.mxu0 %v4489_v0 }
 0x722   :  { %4492 = vmatpush3.bf16.msra.mxu0 %v4489_v0  ;;  %v4517_v0 = vpack.c.bf16 %v1959_v18, %v1958_v17 }
 0x723   :  { %4494 = vmatprep.subr.bf16.mxu0 %v4493_v3 }
 0x726   :  { %4496 = vmatpush3.bf16.msra.mxu0 %v4493_v3 }
 0x7ad   :  { %v1692_v56 = vpop.xlane.xlu1 %1691 }
 0x7ae   :  { %v1695_v57 = vmul.f32 0.03125, %v1692_v56  ;;  %v1689_v58 = vpop.xlane.xlu0 %1688 }
 0x7af   :  { %v1694_v59 = vmul.f32 0.03125, %v1689_v58 }
 0x7b0   :  { %v1697_v60 = vsub.f32 %v1684_v30, %v1695_v57 }
 0x7b1   :  { %v1696_v61 = vsub.f32 %v1683_v54, %v1694_v59 }
 0x7b2   :  { %v1699_v14 = vmul.f32 %v1697_v60, %v1697_v60 }
 0x7b3   :  { %v1698_v62 = vmul.f32 %v1696_v61, %v1696_v61 }
 0x7b4   :  { %v1703_v16 = vsel %vm155_vm1, %v1699_v14, 0.0  ;;  %v1957_v14 = vld [vmem:[#allocation8 + $0x120] sm:$0xff] }
 0x7b5   :  { %v1700_v63 = vsel %vm155_vm1, %v1698_v62, 0.0 }
 0x7b6   :  { %1701 = vadd.xlane.f32.xlu0 %v1700_v63  ;;  %v1956_v63 = vld [vmem:[#allocation8 + $0x100] sm:$0xff] }
 0x7ba   :  { %1704 = vadd.xlane.f32.xlu0 %v1703_v16  ;;  %v4513_v16 = vpack.c.bf16 %v1957_v14, %v1956_v63 }
 0x7bc   :  { %4514 = vmatprep.subr.bf16.mxu0 %v4513_v16 }
 0x843   :  { %v1702_v13 = vpop.xlane.xlu0 %1701 }
 0x844   :  { %v1706_v15 = vmul.f32 0.03125, %v1702_v13 }
 0x846   :  { %v1708_v19 = vadd.f32 1e-05, %v1706_v15 }
 0x847   :  { %v1705_v20 = vpop.xlane.xlu0 %1704 }
 0x848   :  { %4612 = vrsqrt.f32 %v1708_v19  ;;  %v1707_v22 = vmul.f32 0.03125, %v1705_v20 }
 0x84a   :  { %v1709_v23 = vadd.f32 1e-05, %v1707_v22  ;;  %v4004_v22 = vld [vmem:[#allocation6 + $0x5a] ss:$0 sm:$0xff] }
 0x84c   :  { %4614 = vrsqrt.f32 %v1709_v23 }
 0x852   :  { %v4613_v24 = vpop.eup %4612 }
 0x853   :  { %v1712_v26 = vmul.f32 %v4613_v24, %v1696_v61 }
 0x855   :  { %v1718_v28 = vmul.f32 %v3994_v25, %v1712_v26 }
 0x856   :  { %v4615_v31 = vpop.eup %4614 }
 0x857   :  { %v1713_v32 = vmul.f32 %v4615_v31, %v1697_v60  ;;  %v1724_v33 = vadd.f32 %v3995_v27, %v1718_v28 }
 0x859   :  { %v1719_v34 = vmul.f32 %v3994_v25, %v1713_v32  ;;  %4297 = vmatprep.mubr.msk.f32.mxu0 %vm155_vm1, %v1724_v33 }
 0x85b   :  { %v1725_v35 = vadd.f32 %v3995_v27, %v1719_v34 }
 0x85d   :  { %4298 = vmatmul.mubr.msk.f32.vlgmr.msra.gmra.mrb[20].mxu0 %vm155_vm1, %v1725_v35 }
 0x85e   :  { %4516 = vmatpush3.bf16.msra.mxu0 %v4513_v16 }
 0x85f   :  { %4518 = vmatprep.subr.bf16.mxu0 %v4517_v0 }
 0x862   :  { %4520 = vmatpush3.bf16.msra.mxu0 %v4517_v0 }
 0x863   :  { %4330 = vmatprep.subr.mxu0 %v4763_v21 }
 0x930   :  { %v4299_v40 = vpop.f32.mrb[20].mxu0 }
 0x931   :  { %v1813_v41 = vadd.f32 %v4299_v40, %v3996_v39  ;;  %v1807_v42 = vpop.f32.mrb[21].mxu0 }
 0x932   :  { %v1808_v43 = vadd.f32 %v3996_v39, %v1807_v42 }
 0x933   :  { %v1817_v45 = vmax.f32 %v1813_v41, 0.0 }
 0x934   :  { %v1816_v44 = vmax.f32 %v1808_v43, 0.0 }
 0x936   :  { %4316 = vmatprep.mubr.msk.f32.mxu1 %vm1831_vm7, %v1816_v44 }
 0x937   :  { %4317 = vmatmul.mubr.msk.f32.vlgmr.msra.gmra.mrb[18].mxu1 %vm1831_vm7, %v1817_v45 }
 0x938   :  { %4342 = vmatprep.mubr.msk.f32.mxu1 %vm4766_vm2, %v4763_v21 }
 0xa0a   :  { %v4318_v47 = vpop.f32.mrb[18].mxu1 }
 0xa0b   :  { %v1910_v48 = vadd.f32 %v4318_v47, %v3999_v46  ;;  %v1904_v49 = vpop.f32.mrb[19].mxu1 }
 0xa0c   :  { %v1905_v50 = vadd.f32 %v3999_v46, %v1904_v49 }
 0xa0d   :  { %v1914_v51 = vadd.f32 %v1910_v48, %v1725_v35 }
 0xa0e   :  { %v1913_v52 = vadd.f32 %v1905_v50, %v1724_v33 }
 0xa0f   :  { %v1920_v53 = vsel %vm155_vm1, %v1914_v51, 0.0 }
 0xa10   :  { %1921 = vadd.xlane.f32.xlu0 %v1920_v53  ;;  %v1917_v30 = vsel %vm155_vm1, %v1913_v52, 0.0 }
 0xa11   :  { %1918 = vadd.xlane.f32.xlu1 %v1917_v30 }
 0xa9d   :  { %v1922_v54 = vpop.xlane.xlu0 %1921 }
 0xa9e   :  { %v1924_v29 = vmul.f32 0.03125, %v1922_v54  ;;  %v1919_v55 = vpop.xlane.xlu1 %1918 }
 0xa9f   :  { %v1923_v56 = vmul.f32 0.03125, %v1919_v55 }
 0xaa0   :  { %v1926_v57 = vsub.f32 %v1914_v51, %v1924_v29 }
 0xaa1   :  { %v1925_v58 = vsub.f32 %v1913_v52, %v1923_v56 }
 0xaa2   :  { %v1928_v59 = vmul.f32 %v1926_v57, %v1926_v57 }
 0xaa3   :  { %v1927_v60 = vmul.f32 %v1925_v58, %v1925_v58 }
 0xaa4   :  { %v1932_v61 = vsel %vm155_vm1, %v1928_v59, 0.0 }
 0xaa5   :  { %1933 = vadd.xlane.f32.xlu0 %v1932_v61  ;;  %v1929_v62 = vsel %vm155_vm1, %v1927_v60, 0.0 }
 0xaa6   :  { %1930 = vadd.xlane.f32.xlu1 %v1929_v62 }
 0xb32   :  { %v1934_v1 = vpop.xlane.xlu0 %1933 }
 0xb33   :  { %v1936_v2 = vmul.f32 0.03125, %v1934_v1  ;;  %v1931_v3 = vpop.xlane.xlu1 %1930 }
 0xb34   :  { %v1935_v4 = vmul.f32 0.03125, %v1931_v3 }
 0xb35   :  { %v1938_v5 = vadd.f32 1e-05, %v1936_v2 }
 0xb36   :  { %v1937_v6 = vadd.f32 1e-05, %v1935_v4 }
 0xb37   :  { %4616 = vrsqrt.f32 %v1938_v5 }
 0xb38   :  { %4618 = vrsqrt.f32 %v1937_v6 }
 0xb41   :  { %v4617_v7 = vpop.eup %4616 }
 0xb42   :  { %v4619_v9 = vpop.eup %4618  ;;  %v1942_v10 = vmul.f32 %v4617_v7, %v1926_v57 }
 0xb43   :  { %v1941_v11 = vmul.f32 %v4619_v9, %v1925_v58 }
 0xb44   :  { %v1948_v13 = vmul.f32 %v4002_v8, %v1942_v10 }
 0xb45   :  { %v1947_v15 = vmul.f32 %v4002_v8, %v1941_v11 }
 0xb46   :  { %v5055_v20 = vadd.f32 %v4003_v12, %v1948_v13 }
 0xb47   :  { %v5053_v19 = vadd.f32 %v4003_v12, %v1947_v15 }
 0xb49   :  { %4327 = vmatprep.mubr.msk.f32.mxu0 %vm155_vm1, %v5053_v19 }
 0xb4a   :  { %4328 = vmatmul.mubr.msk.f32.vlgmr.msra.gmra.mrb[22].mxu0 %vm155_vm1, %v5055_v20 }
 0xb4b   :  { %4332 = vmatprep.mubr.msk.f32.mxu0 %vm4766_vm2, %v4763_v21 }
 0xc1d   :  { %v4329_v23 = vpop.f32.mrb[22].mxu0 }
 0xc1e   :  { %v2037_v24 = vpop.f32.mrb[23].mxu0  ;;  %v5069_v26 = vadd.f32 %v4329_v23, %v4004_v22 }
 0xc1f   :  { %v5063_v25 = vadd.f32 %v4004_v22, %v2037_v24 }
 0xc21   :  { %2049 = vrot.lane.b32.xlu0 %v5063_v25, %s4767_s24  ;;  %2047 = vrot.lane.b32.xlu1 %v5063_v25, %s4765_s23 }
 0xc25   :  { %2056 = vrot.lane.b32.xlu0 %v5069_v26, %s4767_s24  ;;  %2051 = vrot.lane.b32.xlu1 %v5063_v25, %s4764_s2 }
 0xc29   :  { %2060 = vrot.lane.b32.xlu0 %v5063_v25, %s4768_s26  ;;  %2054 = vrot.lane.b32.xlu1 %v5069_v26, %s4765_s23 }
 0xc2d   :  { %2058 = vrot.lane.b32.xlu1 %v5069_v26, %s4764_s2 }
 0xc93   :  { %v5081_v27 = vpop.permute.xlu0 %2049  ;;  %v5083_v28 = vpop.permute.xlu1 %2047 }
 0xc94   :  { %2212 = vrot.lane.b32.xlu0 %v5081_v27, %s4768_s26  ;;  %2136 = vrot.lane.b32.xlu1 %v5083_v28, %s4768_s26 }
 0xc97   :  { %v5089_v31 = vpop.permute.xlu0 %2056  ;;  %v5091_v32 = vpop.permute.xlu1 %2051 }
 0xc98   :  { %2364 = vrot.lane.b32.xlu0 %v5069_v26, %s4768_s26  ;;  %2288 = vrot.lane.b32.xlu1 %v5091_v32, %s4768_s26 }
 0xc9b   :  { %v2061_v33 = vpop.permute.xlu0 %2060  ;;  %v5097_v34 = vpop.permute.xlu1 %2054 }
 0xc9c   :  { %2516 = vrot.lane.b32.xlu0 %v5089_v31, %s4768_s26  ;;  %4331 = vmatpush3.xpose.msk.msra.mxu0 %vm253_vm3, %v2061_v33 }
 0xc9d   :  { %2440 = vrot.lane.b32.xlu1 %v5097_v34, %s4768_s26  ;;  %4335 = vmatprep.subr.mxu0 %v4763_v21 }
 0xc9f   :  { %4333 = vmatmul.mubr.msk.f32.vlgmr.msra.gmra.mrb[24].mxu0 %vm253_vm3, %v5063_v25  ;;  %v5107_v35 = vpop.permute.xlu1 %2058 }
 0xca0   :  { %4337 = vmatprep.mubr.msk.f32.mxu0 %vm4766_vm2, %v4763_v21 }
 0xca1   :  { %2592 = vrot.lane.b32.xlu1 %v5107_v35, %s4768_s26 }
 0xd06   :  { %v2213_v36 = vpop.permute.xlu0 %2212  ;;  %v2137_v37 = vpop.permute.xlu1 %2136 }
 0xd07   :  { %4336 = vmatpush3.xpose.msk.msra.mxu0 %vm253_vm3, %v2137_v37  ;;  %4341 = vmatpush3.xpose.msk.msra.mxu1 %vm253_vm3, %v2213_v36 }
 0xd08   :  { %4350 = vmatprep.subr.mxu1 %v4763_v21  ;;  %4345 = vmatprep.subr.mxu0 %v4763_v21 }
 0xd0a   :  { %4343 = vmatmul.mubr.msk.f32.vlgmr.msra.gmra.mrb[20].mxu1 %vm253_vm3, %v5081_v27  ;;  %v2365_v38 = vpop.permute.xlu0 %2364  ;;  %4338 = vmatmul.mubr.msk.f32.vlgmr.msra.gmra.mrb[26].mxu0 %vm253_vm3, %v5083_v28  ;;  %v2289_v39 = vpop.permute.xlu1 %2288 }
 0xd0b   :  { %4346 = vmatpush3.xpose.msk.msra.mxu0 %vm253_vm3, %v2289_v39  ;;  %4351 = vmatpush3.xpose.msk.msra.mxu1 %vm253_vm3, %v2365_v38 }
 0xd0c   :  { %4347 = vmatprep.mubr.msk.f32.mxu0 %vm4766_vm2, %v4763_v21  ;;  %4352 = vmatprep.mubr.msk.f32.mxu1 %vm4766_vm2, %v4763_v21 }
 0xd0d   :  { %4360 = vmatprep.subr.mxu1 %v4763_v21  ;;  %4355 = vmatprep.subr.mxu0 %v4763_v21 }
 0xd0e   :  { %4353 = vmatmul.mubr.msk.f32.vlgmr.msra.gmra.mrb[22].mxu1 %vm253_vm3, %v5069_v26  ;;  %v2517_v40 = vpop.permute.xlu0 %2516  ;;  %4348 = vmatmul.mubr.msk.f32.vlgmr.msra.gmra.mrb[28].mxu0 %vm253_vm3, %v5091_v32 }
 0xd0f   :  { %v2441_v41 = vpop.permute.xlu1 %2440  ;;  %4361 = vmatpush3.xpose.msk.msra.mxu1 %vm253_vm3, %v2517_v40  ;;  %4357 = vmatprep.mubr.msk.f32.mxu0 %vm4766_vm2, %v4763_v21 }
 0xd10   :  { %4356 = vmatpush3.xpose.msk.msra.mxu0 %vm253_vm3, %v2441_v41  ;;  %4362 = vmatprep.mubr.msk.f32.mxu1 %vm4766_vm2, %v4763_v21 }
 0xd11   :  { %4365 = vmatprep.subr.mxu0 %v4763_v21  ;;  %4370 = vmatprep.subr.mxu1 %v4763_v21 }
 0xd12   :  { %4363 = vmatmul.mubr.msk.f32.vlgmr.msra.gmra.mrb[24].mxu1 %vm253_vm3, %v5089_v31 }
 0xd13   :  { %4358 = vmatmul.mubr.msk.f32.vlgmr.msra.gmra.mrb[30].mxu0 %vm253_vm3, %v5097_v34  ;;  %v2593_v42 = vpop.permute.xlu1 %2592  ;;  %4372 = vmatprep.mubr.msk.f32.mxu1 %vm4766_vm2, %v4763_v21 }
 0xd14   :  { %4366 = vmatpush3.xpose.msk.msra.mxu0 %vm253_vm3, %v2593_v42  ;;  %4367 = vmatprep.mubr.msk.f32.mxu0 %vm4766_vm2, %v4763_v21 }
 0xd15   :  { %4375 = vmatprep.subr.mxu0 %v4763_v21 }
 0xd17   :  { %4368 = vmatmul.mubr.msk.f32.vlgmr.msra.gmra.mrb[32].mxu0 %vm253_vm3, %v5107_v35 }
 0xd18   :  { %4377 = vmatprep.mubr.msk.f32.mxu0 %vm4766_vm2, %v4763_v21 }
 0xd72   :  { %v2132_v43 = vpop.f32.mrb[24].mxu0 }
 0xd73   :  { %v4334_v44 = vpop.f32.mrb[25].mxu0  ;;  %v2668_v45 = vsel %vm253_vm3, %v2132_v43, -inf }
 0xd74   :  { %2669 = vmax.xlane.f32.xlu0 %v2668_v45 }
 0xddd   :  { %v2208_v46 = vpop.f32.mrb[26].mxu0  ;;  %v2284_v47 = vpop.f32.mrb[20].mxu1 }
 0xdde   :  { %v4339_v48 = vpop.f32.mrb[27].mxu0  ;;  %v4344_v49 = vpop.f32.mrb[21].mxu1  ;;  %v2674_v50 = vsel %vm253_vm3, %v2284_v47, -inf  ;;  %v2671_v51 = vsel %vm253_vm3, %v2208_v46, -inf }
 0xddf   :  { %2675 = vmax.xlane.f32.xlu0 %v2674_v50  ;;  %2672 = vmax.xlane.f32.xlu1 %v2671_v51 }
 0xde1   :  { %v2360_v52 = vpop.f32.mrb[28].mxu0  ;;  %v2436_v53 = vpop.f32.mrb[22].mxu1 }
 0xde2   :  { %v4349_v30 = vpop.f32.mrb[29].mxu0  ;;  %v4354_v54 = vpop.f32.mrb[23].mxu1  ;;  %v2680_v29 = vsel %vm253_vm3, %v2436_v53, -inf  ;;  %v2677_v55 = vsel %vm253_vm3, %v2360_v52, -inf }
 0xde3   :  { %2681 = vmax.xlane.f32.xlu1 %v2680_v29  ;;  %2678 = vmax.xlane.f32.xlu0 %v2677_v55 }
 0xde5   :  { %v2588_v56 = vpop.f32.mrb[24].mxu1 }
 0xde6   :  { %v2512_v57 = vpop.f32.mrb[30].mxu0  ;;  %v4364_v58 = vpop.f32.mrb[25].mxu1  ;;  %v2686_v59 = vsel %vm253_vm3, %v2588_v56, -inf }
 0xde7   :  { %v4359_v60 = vpop.f32.mrb[31].mxu0  ;;  %2687 = vmax.xlane.f32.xlu1 %v2686_v59  ;;  %v2683_v61 = vsel %vm253_vm3, %v2512_v57, -inf }
 0xde8   :  { %2684 = vmax.xlane.f32.xlu0 %v2683_v61 }
 0xdea   :  { %v2664_v62 = vpop.f32.mrb[32].mxu0 }
 0xdeb   :  { %v4369_v63 = vpop.f32.mrb[33].mxu0  ;;  %v2689_v14 = vsel %vm253_vm3, %v2664_v62, -inf }
 0xdec   :  { %2690 = vmax.xlane.f32.xlu0 %v2689_v14 }
 0xdf8   :  { %2756 = vrot.lane.b32.xlu1 %v5063_v25, %s4769_s27 }
 0xdfc   :  { %2908 = vrot.lane.b32.xlu1 %v5081_v27, %s4769_s27 }
 0xe00   :  { %2984 = vrot.lane.b32.xlu1 %v5091_v32, %s4769_s27 }
 0xe01   :  { %v2670_v16 = vpop.xlane.xlu0 %2669 }
 0xe02   :  { %2832 = vrot.lane.b32.xlu0 %v5083_v28, %s4769_s27  ;;  %v2692_v17 = vsub.f32 %v2132_v43, %v2670_v16 }
 0xe04   :  { %3136 = vrot.lane.b32.xlu1 %v5097_v34, %s4769_s27  ;;  %v2700_v18 = vmul.f32 1.442695, %v2692_v17 }
 0xe06   :  { %3060 = vrot.lane.b32.xlu0 %v5069_v26, %s4769_s27  ;;  %4620 = vpow2.f32 %v2700_v18 }
 0xe10   :  { %v5175_v0 = vpop.eup %4620 }
 0xe11   :  { %v2716_v1 = vsel %vm253_vm3, %v5175_v0, 0.0 }
 0xe28   :  { %2717 = vadd.xlane.f32.xlu1 %v2716_v1 }
 0xe6c   :  { %v2676_v2 = vpop.xlane.xlu0 %2675  ;;  %v2673_v3 = vpop.xlane.xlu1 %2672 }
 0xe6d   :  { %v2694_v4 = vsub.f32 %v2284_v47, %v2676_v2  ;;  %v2693_v5 = vsub.f32 %v2208_v46, %v2673_v3 }
 0xe6f   :  { %v2704_v6 = vmul.f32 1.442695, %v2694_v4  ;;  %v2702_v7 = vmul.f32 1.442695, %v2693_v5 }
 0xe70   :  { %v2679_v8 = vpop.xlane.xlu0 %2678  ;;  %v2682_v9 = vpop.xlane.xlu1 %2681 }
 0xe71   :  { %4622 = vpow2.f32 %v2704_v6  ;;  %v2695_v10 = vsub.f32 %v2360_v52, %v2679_v8  ;;  %v2696_v11 = vsub.f32 %v2436_v53, %v2682_v9 }
 0xe72   :  { %4624 = vpow2.f32 %v2702_v7 }
 0xe73   :  { %v2706_v12 = vmul.f32 1.442695, %v2695_v10  ;;  %v2708_v13 = vmul.f32 1.442695, %v2696_v11 }
 0xe74   :  { %v2688_v15 = vpop.xlane.xlu1 %2687 }
 0xe75   :  { %4626 = vpow2.f32 %v2706_v12  ;;  %v2685_v22 = vpop.xlane.xlu0 %2684  ;;  %v2698_v23 = vsub.f32 %v2588_v56, %v2688_v15  ;;  %v3399_v15 = vld [vmem:[#allocation8 + $0x128] sm:$0xff] }
 0xe76   :  { %4628 = vpow2.f32 %v2708_v13  ;;  %v2697_v24 = vsub.f32 %v2512_v57, %v2685_v22  ;;  %v3398_v13 = vld [vmem:[#allocation8 + $0x108] sm:$0xff] }
 0xe77   :  { %v2712_v25 = vmul.f32 1.442695, %v2698_v23  ;;  %v4521_v23 = vpack.c.bf16 %v3399_v15, %v3398_v13 }
 0xe78   :  { %v2710_v26 = vmul.f32 1.442695, %v2697_v24  ;;  %v2757_v27 = vpop.permute.xlu1 %2756  ;;  %v3400_v24 = vld [vmem:[#allocation8 + $0x148] sm:$0xff] }
 0xe79   :  { %4630 = vpow2.f32 %v2712_v25  ;;  %v2691_v28 = vpop.xlane.xlu0 %2690  ;;  %4371 = vmatpush3.msra.mxu1 %v2757_v27  ;;  %v3401_v25 = vld [vmem:[#allocation8 + $0x168] sm:$0xff] }
 0xe7a   :  { %4632 = vpow2.f32 %v2710_v26  ;;  %v2699_v32 = vsub.f32 %v2664_v62, %v2691_v28  ;;  %4380 = vmatprep.subr.mxu1 %v4763_v21  ;;  %v4525_v26 = vpack.c.bf16 %v3401_v25, %v3400_v24  ;;  %v4035_v25 = vld [vmem:[#allocation6 + $0x5f] ss:$0 sm:$0xff] }
 0xe7b   :  { %v4623_v33 = vpop.eup %4622 }
 0xe7c   :  { %v4625_v34 = vpop.eup %4624  ;;  %v2714_v36 = vmul.f32 1.442695, %v2699_v32  ;;  %v2722_v37 = vsel %vm253_vm3, %v4623_v33, 0.0  ;;  %v2909_v50 = vpop.permute.xlu1 %2908 }
 0xe7d   :  { %v2833_v38 = vpop.permute.xlu0 %2832  ;;  %2723 = vadd.xlane.f32.xlu1 %v2722_v37  ;;  %v2719_v39 = vsel %vm253_vm3, %v4625_v34, 0.0 }
 0xe7e   :  { %4634 = vpow2.f32 %v2714_v36  ;;  %4376 = vmatpush3.msra.mxu0 %v2833_v38  ;;  %2720 = vadd.xlane.f32.xlu0 %v2719_v39 }
 0xe7f   :  { %v4627_v40 = vpop.eup %4626  ;;  %4385 = vmatprep.subr.mxu0 %v4763_v21 }
 0xe80   :  { %v4629_v41 = vpop.eup %4628  ;;  %v2725_v42 = vsel %vm253_vm3, %v4627_v40, 0.0  ;;  %v2985_v51 = vpop.permute.xlu1 %2984 }
 0xe81   :  { %v2728_v43 = vsel %vm253_vm3, %v4629_v41, 0.0 }
 0xe82   :  { %2726 = vadd.xlane.f32.xlu0 %v2725_v42  ;;  %2729 = vadd.xlane.f32.xlu1 %v2728_v43 }
 0xe83   :  { %v4631_v44 = vpop.eup %4630 }
 0xe84   :  { %v4633_v45 = vpop.eup %4632  ;;  %v2734_v46 = vsel %vm253_vm3, %v4631_v44, 0.0  ;;  %v3137_v52 = vpop.permute.xlu1 %3136 }
 0xe85   :  { %v2731_v47 = vsel %vm253_vm3, %v4633_v45, 0.0 }
 0xe86   :  { %2732 = vadd.xlane.f32.xlu0 %v2731_v47  ;;  %2735 = vadd.xlane.f32.xlu1 %v2734_v46 }
 0xe88   :  { %v5187_v48 = vpop.eup %4634 }
 0xe89   :  { %v2737_v49 = vsel %vm253_vm3, %v5187_v48, 0.0 }
 0xe8a   :  { %2738 = vadd.xlane.f32.xlu0 %v2737_v49  ;;  %v4031_v49 = vld [vmem:[#allocation6 + $0x5b] ss:$0 sm:$0xff] }
 0xe97   :  { %3288 = vrot.lane.b32.xlu1 %v5107_v35, %s4769_s27  ;;  %v3061_v35 = vpop.permute.xlu0 %3060 }
 0xea0   :  { %3212 = vrot.lane.b32.xlu0 %v5089_v31, %s4769_s27 }
 0xeb5   :  { %v2718_v53 = vpop.xlane.xlu1 %2717 }
 0xeb6   :  { %4636 = vrcp.f32 %v2718_v53 }
 0xec0   :  { %v4637_v30 = vpop.eup %4636 }
 0xec1   :  { %v2748_v54 = vmul.f32 %v4637_v30, %v5175_v0 }
 0xec3   :  { %4373 = vmatmul.mubr.msk.f32.vlgmr.msra.gmra.mrb[26].mxu1 %vm253_vm3, %v2748_v54 }
 0xec4   :  { %4381 = vmatpush3.msra.mxu1 %v2909_v50  ;;  %4382 = vmatprep.mubr.msk.f32.mxu1 %vm4766_vm2, %v4763_v21 }
 0xec5   :  { %4390 = vmatprep.subr.mxu1 %v4763_v21 }
 0xf0a   :  { %v2724_v29 = vpop.xlane.xlu1 %2723 }
 0xf0b   :  { %v2721_v55 = vpop.xlane.xlu0 %2720  ;;  %4638 = vrcp.f32 %v2724_v29 }
 0xf0c   :  { %4640 = vrcp.f32 %v2721_v55 }
 0xf0f   :  { %v2727_v31 = vpop.xlane.xlu0 %2726  ;;  %v2730_v56 = vpop.xlane.xlu1 %2729 }
 0xf10   :  { %4642 = vrcp.f32 %v2727_v31 }
 0xf11   :  { %4644 = vrcp.f32 %v2730_v56 }
 0xf13   :  { %v2733_v57 = vpop.xlane.xlu0 %2732  ;;  %v2736_v58 = vpop.xlane.xlu1 %2735 }
 0xf14   :  { %4646 = vrcp.f32 %v2733_v57 }
 0xf15   :  { %v4639_v59 = vpop.eup %4638  ;;  %4648 = vrcp.f32 %v2736_v58 }
 0xf16   :  { %v4641_v60 = vpop.eup %4640  ;;  %v2750_v61 = vmul.f32 %v4639_v59, %v4623_v33 }
 0xf17   :  { %v2749_v62 = vmul.f32 %v4641_v60, %v4625_v34  ;;  %v2739_v63 = vpop.xlane.xlu0 %2738  ;;  %v3289_v5 = vpop.permute.xlu1 %3288 }
 0xf18   :  { %4650 = vrcp.f32 %v2739_v63  ;;  %4383 = vmatmul.mubr.msk.f32.vlgmr.msra.gmra.mrb[28].mxu1 %vm253_vm3, %v2750_v61  ;;  %v3531_v63 = vld [vmem:[#allocation8 + $0x130] sm:$0xff] }
 0xf19   :  { %4378 = vmatmul.mubr.msk.f32.vlgmr.msra.gmra.mrb[34].mxu0 %vm253_vm3, %v2749_v62  ;;  %4391 = vmatpush3.msra.mxu1 %v3061_v35 }
 0xf1a   :  { %v4643_v14 = vpop.eup %4642  ;;  %4386 = vmatpush3.msra.mxu0 %v2985_v51  ;;  %4387 = vmatprep.mubr.msk.f32.mxu0 %vm4766_vm2, %v4763_v21 }
 0xf1b   :  { %v4645_v16 = vpop.eup %4644  ;;  %v2751_v17 = vmul.f32 %v4643_v14, %v4627_v40  ;;  %4392 = vmatprep.mubr.msk.f32.mxu1 %vm4766_vm2, %v4763_v21  ;;  %4395 = vmatprep.subr.mxu0 %v4763_v21  ;;  %v3213_v0 = vpop.permute.xlu0 %3212 }
 0xf1c   :  { %v2752_v18 = vmul.f32 %v4645_v16, %v4629_v41  ;;  %4400 = vmatprep.subr.mxu1 %v4763_v21  ;;  %v3532_v16 = vld [vmem:[#allocation8 + $0x150] sm:$0xff] }
 0xf1d   :  { %4388 = vmatmul.mubr.msk.f32.vlgmr.msra.gmra.mrb[36].mxu0 %vm253_vm3, %v2751_v17  ;;  %v3533_v17 = vld [vmem:[#allocation8 + $0x170] sm:$0xff] }
 0xf1e   :  { %v4647_v1 = vpop.eup %4646  ;;  %4393 = vmatmul.mubr.msk.f32.vlgmr.msra.gmra.mrb[30].mxu1 %vm253_vm3, %v2752_v18  ;;  %4396 = vmatpush3.msra.mxu0 %v3137_v52  ;;  %v4533_v18 = vpack.c.bf16 %v3533_v17, %v3532_v16  ;;  %v4042_v17 = vld [vmem:[#allocation6 + $0x60] ss:$0 sm:$0xff] }
 0xf1f   :  { %v4649_v2 = vpop.eup %4648  ;;  %v2753_v3 = vmul.f32 %v4647_v1, %v4633_v45  ;;  %4401 = vmatpush3.msra.mxu1 %v3213_v0  ;;  %4397 = vmatprep.mubr.msk.f32.mxu0 %vm4766_vm2, %v4763_v21  ;;  %v3622_v0 = vld [vmem:[#allocation8 + $0x118] sm:$0xff] }
 0xf20   :  { %v2754_v4 = vmul.f32 %v4649_v2, %v4631_v44  ;;  %4402 = vmatprep.mubr.msk.f32.mxu1 %vm4766_vm2, %v4763_v21  ;;  %4405 = vmatprep.subr.mxu0 %v4763_v21  ;;  %v3623_v1 = vld [vmem:[#allocation8 + $0x138] sm:$0xff] }
 0xf21   :  { %4398 = vmatmul.mubr.msk.f32.vlgmr.msra.gmra.mrb[38].mxu0 %vm253_vm3, %v2753_v3  ;;  %4522 = vmatprep.subr.bf16.mxu1 %v4521_v23  ;;  %v3624_v2 = vld [vmem:[#allocation8 + $0x158] sm:$0xff]  ;;  %v4537_v3 = vpack.c.bf16 %v3623_v1, %v3622_v0 }
 0xf22   :  { %v4651_v6 = vpop.eup %4650  ;;  %4403 = vmatmul.mubr.msk.f32.vlgmr.msra.gmra.mrb[32].mxu1 %vm253_vm3, %v2754_v4  ;;  %4406 = vmatpush3.msra.mxu0 %v3289_v5  ;;  %v3625_v4 = vld [vmem:[#allocation8 + $0x178] sm:$0xff] }
 0xf23   :  { %v2755_v7 = vmul.f32 %v4651_v6, %v5187_v48  ;;  %4407 = vmatprep.mubr.msk.f32.mxu0 %vm4766_vm2, %v4763_v21  ;;  %4524 = vmatpush3.bf16.msra.mxu1 %v4521_v23  ;;  %v4541_v5 = vpack.c.bf16 %v3625_v4, %v3624_v2  ;;  %v3626_v6 = vld [vmem:[#allocation8 + $0x198] sm:$0xff]  ;;  %v4034_v23 = vld [vmem:[#allocation6 + $0x5e] ss:$0 sm:$0xff] }
 0xf24   :  { %4526 = vmatprep.subr.bf16.mxu1 %v4525_v26  ;;  %v4043_v1 = vld [vmem:[#allocation6 + $0x61] ss:$0 sm:$0xff] }
 0xf25   :  { %4408 = vmatmul.mubr.msk.f32.vlgmr.msra.gmra.mrb[40].mxu0 %vm253_vm3, %v2755_v7  ;;  %v3627_v7 = vld [vmem:[#allocation8 + $0x1b8] sm:$0xff] }
 0xf27   :  { %4528 = vmatpush3.bf16.msra.mxu1 %v4525_v26 }
 0xf28   :  { %4538 = vmatprep.subr.bf16.mxu1 %v4537_v3 }
 0xf96   :  { %v2828_v8 = vpop.f32.mrb[26].mxu1 }
 0xf97   :  { %3364 = vst.msk [vmem:[#allocation2] sm:$0xff] %vm253_vm3, %v2828_v8  ;;  %v4374_v9 = vpop.f32.mrb[27].mxu1  ;;  %v4545_v8 = vpack.c.bf16 %v3627_v7, %v3626_v6 }
 0xfeb   :  { %v2980_v10 = vpop.f32.mrb[28].mxu1 }
 0xfec   :  { %v2904_v11 = vpop.f32.mrb[34].mxu0  ;;  %3371 = vrot.lane.b32.xlu1 %v2980_v10, %s4770_s28  ;;  %v4384_v12 = vpop.f32.mrb[29].mxu1 }
 0xfed   :  { %3366 = vrot.lane.b32.xlu0 %v2904_v11, %s4759_s25  ;;  %v4379_v22 = vpop.f32.mrb[35].mxu0 }
 0xff0   :  { %v3056_v27 = vpop.f32.mrb[36].mxu0 }
 0xff1   :  { %v3132_v28 = vpop.f32.mrb[30].mxu1  ;;  %v4389_v32 = vpop.f32.mrb[37].mxu0  ;;  %3376 = vrot.lane.b32.xlu1 %v3056_v27, %s4771_s29 }
 0xff2   :  { %3380 = vst.msk [vmem:[#allocation2 + $0x8] sm:$0xff] %vm253_vm3, %v3132_v28  ;;  %v4394_v33 = vpop.f32.mrb[31].mxu1 }
 0xff4   :  { %v3208_v34 = vpop.f32.mrb[38].mxu0 }
 0xff5   :  { %v3284_v36 = vpop.f32.mrb[32].mxu1  ;;  %3382 = vrot.lane.b32.xlu0 %v3208_v34, %s4759_s25  ;;  %v4399_v37 = vpop.f32.mrb[39].mxu0  ;;  %s4773_s25 = smov [#allocation9]  }
 0xff6   :  { %v4404_v38 = vpop.f32.mrb[33].mxu1  ;;  %v3629_v37 = vld [vmem:[#allocation8 + $0x1f8] sm:$0xff]  ;;  %s3952_s30 = sshll.u32 %s4773_s25, 4  ;;  %s3953_s30 = int_to_ptr.vmem [resolvable:$true] %s3952_s30 }
 0xff7   :  { %s4728_s4 = scalar_lea.vmem %s3953_s30, 32  ;;  %p4733_p11 = scmp.lt.s32.totalorder %s3953_s30, %s3953_s30 }
 0xff8   :  { %v3360_v39 = vpop.f32.mrb[40].mxu0  ;;  %p4729_p10 = scmp.ne.s32.totalorder %s3953_s30, %s4728_s4  ;;  %p4734_p12 = scmp.lt.s32.totalorder %s4728_s4, %s4728_s4 }
 0xff9   :  { %3387 = vrot.lane.b32.xlu0 %v3284_v36, %s4770_s28  ;;  %3392 = vrot.lane.b32.xlu1 %v3360_v39, %s4771_s29  ;;  %v4409_v40 = vpop.f32.mrb[41].mxu0  ;;  %v3628_v36 = vld [vmem:[#allocation8 + $0x1d8] sm:$0xff]  ;;  %v4036_v39 = vld [vmem:[#allocation6 + $0x5c] ss:$0 sm:$0xff] }
 0xffa   :  { %v4549_v38 = vpack.c.bf16 %v3629_v37, %v3628_v36  ;;  %p4735_p13 = por %p4734_p12, %p4733_p11 }
 0xffc   :  { %p4736_p0 = pnand %p4735_p13, %p4729_p10 }
0x105e   :  { %v3372_v41 = vpop.permute.xlu1 %3371 }
0x105f   :  { %v3367_v42 = vpop.permute.xlu0 %3366 }
0x1060   :  { %3369 = vst.msk [vmem:[#allocation2] sm:$0xff] %vm1561_vm4, %v3367_v42 }
0x1061   :  { %3374 = vst.msk [vmem:[#allocation2] sm:$0xff] %vm1567_vm5, %v3372_v41 }
0x1063   :  { %v3377_v43 = vpop.permute.xlu1 %3376 }
0x1064   :  { %3379 = vst.msk [vmem:[#allocation2] sm:$0xff] %vm1573_vm6, %v3377_v43 }
0x1067   :  { %v3383_v44 = vpop.permute.xlu0 %3382 }
0x1068   :  { %3385 = vst.msk [vmem:[#allocation2 + $0x8] sm:$0xff] %vm1561_vm4, %v3383_v44 }
0x106b   :  { %v3388_v45 = vpop.permute.xlu0 %3387  ;;  %v3393_v46 = vpop.permute.xlu1 %3392  ;;  %v3396_v47 = vld [vmem:[#allocation2] sm:$0xff] }
0x106c   :  { %3390 = vst.msk [vmem:[#allocation2 + $0x8] sm:$0xff] %vm1567_vm5, %v3388_v45  ;;  %4418 = vmatprep.mubr.msk.f32.mxu1 %vm155_vm1, %v3396_v47 }
0x106d   :  { %3395 = vst.msk [vmem:[#allocation2 + $0x8] sm:$0xff] %vm1573_vm6, %v3393_v46  ;;  %v4039_v46 = vld [vmem:[#allocation6 + $0x5d] ss:$0 sm:$0xff] }
0x1074   :  { %v3397_v48 = vld [vmem:[#allocation2 + $0x8] sm:$0xff] }
0x1075   :  { %4419 = vmatmul.mubr.msk.f32.vlgmr.msra.gmra.mrb[34].mxu1 %vm155_vm1, %v3397_v48 }
0x1076   :  { %4540 = vmatpush3.bf16.msra.mxu1 %v4537_v3 }
0x1077   :  { %4542 = vmatprep.subr.bf16.mxu1 %v4541_v5 }
0x107a   :  { %4544 = vmatpush3.bf16.msra.mxu1 %v4541_v5 }
0x107b   :  { %4546 = vmatprep.subr.bf16.mxu1 %v4545_v8 }
0x107e   :  { %4548 = vmatpush3.bf16.msra.mxu1 %v4545_v8 }
0x107f   :  { %4550 = vmatprep.subr.bf16.mxu1 %v4549_v38 }
0x1082   :  { %4552 = vmatpush3.bf16.msra.mxu1 %v4549_v38  ;;  %v4044_v38 = vld [vmem:[#allocation6 + $0x50] ss:$0 sm:$0xff] }
0x1148   :  { %v4420_v50 = vpop.f32.mrb[34].mxu1 }
0x1149   :  { %v3485_v51 = vadd.f32 %v4420_v50, %v4031_v49  ;;  %v3479_v52 = vpop.f32.mrb[35].mxu1 }
0x114a   :  { %v3480_v53 = vadd.f32 %v4031_v49, %v3479_v52 }
0x114b   :  { %v3489_v30 = vadd.f32 %v3485_v51, %v5055_v20 }
0x114c   :  { %v3488_v54 = vadd.f32 %v3480_v53, %v5053_v19  ;;  %v3530_v19 = vld [vmem:[#allocation8 + $0x110] sm:$0xff] }
0x114d   :  { %v3495_v35 = vsel %vm155_vm1, %v3489_v30, 0.0  ;;  %v4529_v14 = vpack.c.bf16 %v3531_v63, %v3530_v19 }
0x114e   :  { %3496 = vadd.xlane.f32.xlu1 %v3495_v35  ;;  %v3492_v29 = vsel %vm155_vm1, %v3488_v54, 0.0 }
0x114f   :  { %3493 = vadd.xlane.f32.xlu0 %v3492_v29  ;;  %4530 = vmatprep.subr.bf16.mxu0 %v4529_v14 }
0x1150   :  { %4532 = vmatpush3.bf16.msra.mxu0 %v4529_v14 }
0x1151   :  { %4534 = vmatprep.subr.bf16.mxu0 %v4533_v18 }
0x1154   :  { %4536 = vmatpush3.bf16.msra.mxu0 %v4533_v18 }
0x11db   :  { %v3497_v55 = vpop.xlane.xlu1 %3496 }
0x11dc   :  { %v3499_v31 = vmul.f32 0.03125, %v3497_v55  ;;  %v3494_v56 = vpop.xlane.xlu0 %3493 }
0x11dd   :  { %v3498_v57 = vmul.f32 0.03125, %v3494_v56 }
0x11de   :  { %v3501_v58 = vsub.f32 %v3489_v30, %v3499_v31 }
0x11df   :  { %v3500_v59 = vsub.f32 %v3488_v54, %v3498_v57 }
0x11e0   :  { %v3503_v62 = vmul.f32 %v3501_v58, %v3501_v58 }
0x11e1   :  { %v3502_v60 = vmul.f32 %v3500_v59, %v3500_v59 }
0x11e2   :  { %v3507_v20 = vsel %vm155_vm1, %v3503_v62, 0.0 }
0x11e3   :  { %v3504_v61 = vsel %vm155_vm1, %v3502_v60, 0.0 }
0x11e4   :  { %3505 = vadd.xlane.f32.xlu0 %v3504_v61 }
0x11e8   :  { %3508 = vadd.xlane.f32.xlu0 %v3507_v20 }
0x1271   :  { %v3506_v9 = vpop.xlane.xlu0 %3505 }
0x1272   :  { %v3510_v10 = vmul.f32 0.03125, %v3506_v9 }
0x1274   :  { %v3512_v11 = vadd.f32 1e-05, %v3510_v10 }
0x1275   :  { %v3509_v12 = vpop.xlane.xlu0 %3508 }
0x1276   :  { %4652 = vrsqrt.f32 %v3512_v11  ;;  %v3511_v13 = vmul.f32 0.03125, %v3509_v12 }
0x1278   :  { %v3513_v15 = vadd.f32 1e-05, %v3511_v13 }
0x127a   :  { %4654 = vrsqrt.f32 %v3513_v15 }
0x1280   :  { %v4653_v22 = vpop.eup %4652 }
0x1281   :  { %v3516_v24 = vmul.f32 %v4653_v22, %v3500_v59 }
0x1283   :  { %v3522_v26 = vmul.f32 %v4034_v23, %v3516_v24  ;;  %v3793_v24 = vld [vmem:[#allocation6 + $0x28] sm:$0xff] }
0x1284   :  { %v4655_v27 = vpop.eup %4654 }
0x1285   :  { %v3517_v28 = vmul.f32 %v4655_v27, %v3501_v58  ;;  %v3528_v32 = vadd.f32 %v4035_v25, %v3522_v26  ;;  %v4772_v26 = vmov 0.0|0.0   ;;  %v3794_v27 = vld [vmem:[#allocation6 + $0x30] sm:$0xff] }
0x1286   :  { %4553 = vmatprep.subr.bf16.mxu0 %v4772_v26 }
0x1287   :  { %v3523_v33 = vmul.f32 %v4034_v23, %v3517_v28  ;;  %4429 = vmatprep.mubr.msk.f32.mxu0 %vm155_vm1, %v3528_v32  ;;  %v3792_v23 = vld [vmem:[#allocation6 + $0x20] sm:$0xff]  ;;  %v3795_v28 = vld [vmem:[#allocation6 + $0x38] sm:$0xff] }
0x1289   :  { %v3529_v34 = vadd.f32 %v4035_v25, %v3523_v33  ;;  %v4554_v25 = vpack.c.bf16 %v3793_v24, %v3792_v23 }
0x128b   :  { %4430 = vmatmul.mubr.msk.f32.vlgmr.msra.gmra.mrb[42].mxu0 %vm155_vm1, %v3529_v34 }
0x128c   :  { %4459 = vmatprep.mubr.msk.f32.mxu0 %vm4766_vm2, %v4763_v21  ;;  %4555 = vmatpush3.bf16.msra.mxu0 %v4554_v25 }
0x128d   :  { %4556 = vmatprep.subr.bf16.mxu0 %v4772_v26 }
0x135e   :  { %v4431_v40 = vpop.f32.mrb[42].mxu0 }
0x135f   :  { %v3617_v41 = vadd.f32 %v4431_v40, %v4036_v39  ;;  %v3611_v42 = vpop.f32.mrb[43].mxu0  ;;  %v4045_v40 = vld [vmem:[#allocation6 + $0x51] ss:$0 sm:$0xff] }
0x1360   :  { %v3612_v43 = vadd.f32 %v4036_v39, %v3611_v42 }
0x1361   :  { %v3621_v45 = vmax.f32 %v3617_v41, 0.0 }
0x1362   :  { %v3620_v44 = vmax.f32 %v3612_v43, 0.0  ;;  %v3870_v43 = vld [vmem:[#allocation6 + $0x40] sm:$0xff] }
0x1364   :  { %4448 = vmatprep.mubr.msk.f32.mxu1 %vm1831_vm7, %v3620_v44  ;;  %v3871_v44 = vld [vmem:[#allocation6 + $0x48] sm:$0xff] }
0x1365   :  { %4449 = vmatmul.mubr.msk.f32.vlgmr.msra.gmra.mrb[36].mxu1 %vm1831_vm7, %v3621_v45  ;;  %v4560_v45 = vpack.c.bf16 %v3871_v44, %v3870_v43 }
0x1438   :  { %v4450_v47 = vpop.f32.mrb[36].mxu1 }
0x1439   :  { %v3713_v48 = vadd.f32 %v4450_v47, %v4039_v46  ;;  %v3707_v49 = vpop.f32.mrb[37].mxu1 }
0x143a   :  { %v3708_v50 = vadd.f32 %v4039_v46, %v3707_v49 }
0x143b   :  { %v3717_v51 = vadd.f32 %v3713_v48, %v3529_v34 }
0x143c   :  { %v3716_v52 = vadd.f32 %v3708_v50, %v3528_v32  ;;  %v4557_v32 = vpack.c.bf16 %v3795_v28, %v3794_v27 }
0x143d   :  { %v3723_v53 = vsel %vm155_vm1, %v3717_v51, 0.0 }
0x143e   :  { %3724 = vadd.xlane.f32.xlu0 %v3723_v53  ;;  %v3720_v30 = vsel %vm155_vm1, %v3716_v52, 0.0  ;;  %4558 = vmatpush3.bf16.msra.mxu0 %v4557_v32 }
0x143f   :  { %3721 = vadd.xlane.f32.xlu1 %v3720_v30  ;;  %4559 = vmatprep.subr.bf16.mxu0 %v4772_v26 }
0x14cb   :  { %v3725_v54 = vpop.xlane.xlu0 %3724 }
0x14cc   :  { %v3727_v35 = vmul.f32 0.03125, %v3725_v54  ;;  %v3722_v29 = vpop.xlane.xlu1 %3721 }
0x14cd   :  { %v3726_v55 = vmul.f32 0.03125, %v3722_v29 }
0x14ce   :  { %v3729_v31 = vsub.f32 %v3717_v51, %v3727_v35 }
0x14cf   :  { %v3728_v56 = vsub.f32 %v3716_v52, %v3726_v55 }
0x14d0   :  { %v3731_v57 = vmul.f32 %v3729_v31, %v3729_v31 }
0x14d1   :  { %v3730_v58 = vmul.f32 %v3728_v56, %v3728_v56 }
0x14d2   :  { %v3735_v59 = vsel %vm155_vm1, %v3731_v57, 0.0 }
0x14d3   :  { %3736 = vadd.xlane.f32.xlu0 %v3735_v59  ;;  %v3732_v60 = vsel %vm155_vm1, %v3730_v58, 0.0 }
0x14d4   :  { %3733 = vadd.xlane.f32.xlu1 %v3732_v60 }
0x1560   :  { %v3737_v61 = vpop.xlane.xlu0 %3736 }
0x1561   :  { %v3739_v62 = vmul.f32 0.03125, %v3737_v61  ;;  %v3734_v20 = vpop.xlane.xlu1 %3733 }
0x1562   :  { %v3738_v19 = vmul.f32 0.03125, %v3734_v20 }
0x1563   :  { %v3741_v63 = vadd.f32 1e-05, %v3739_v62 }
0x1564   :  { %v3740_v14 = vadd.f32 1e-05, %v3738_v19 }
0x1565   :  { %4656 = vrsqrt.f32 %v3741_v63 }
0x1566   :  { %4658 = vrsqrt.f32 %v3740_v14 }
0x156f   :  { %v4657_v16 = vpop.eup %4656 }
0x1570   :  { %v4659_v18 = vpop.eup %4658  ;;  %v3745_v0 = vmul.f32 %v4657_v16, %v3729_v31 }
0x1571   :  { %v3744_v2 = vmul.f32 %v4659_v18, %v3728_v56 }
0x1572   :  { %v3751_v3 = vmul.f32 %v4042_v17, %v3745_v0 }
0x1573   :  { %v3750_v4 = vmul.f32 %v4042_v17, %v3744_v2 }
0x1574   :  { %v3757_v5 = vadd.f32 %v4043_v1, %v3751_v3 }
0x1575   :  { %v3756_v6 = vadd.f32 %v4043_v1, %v3750_v4 }
0x1576   :  { %v3762_v7 = vrot.slane %v3757_v5, 6 }
0x1577   :  { %v3759_v8 = vrot.slane %v3756_v6, 7 }
0x1579   :  { %v3765_v9 = vsel %vm3764_vm8, %v3759_v8, %v3762_v7 }
0x157a   :  { %v3769_v10 = vsel %vm3768_vm9, %v3765_v9, 0.0 }
0x157b   :  { %3770 = vadd.xlane.f32.xlu1 %v3769_v10 }
0x1608   :  { %v3771_v11 = vpop.xlane.xlu1 %3770 }
0x1609   :  { %v3772_v12 = vmul.f32 0.03125, %v3771_v11 }
0x160b   :  { %v3773_v13 = vsub.f32 %v3765_v9, %v3772_v12 }
0x160d   :  { %v3774_v15 = vmul.f32 %v3773_v13, %v3773_v13 }
0x160f   :  { %v3775_v22 = vsel %vm3768_vm9, %v3774_v15, 0.0 }
0x1610   :  { %3776 = vadd.xlane.f32.xlu0 %v3775_v22 }
0x169d   :  { %v3777_v33 = vpop.xlane.xlu0 %3776 }
0x169e   :  { %v3778_v34 = vmul.f32 0.03125, %v3777_v33 }
0x16a0   :  { %v3779_v36 = vadd.f32 1e-05, %v3778_v34 }
0x16a2   :  { %4660 = vrsqrt.f32 %v3779_v36 }
0x16ac   :  { %v4661_v37 = vpop.eup %4660 }
0x16ad   :  { %v3781_v39 = vmul.f32 %v4661_v37, %v3773_v13 }
0x16af   :  { %v3786_v41 = vmul.f32 %v4044_v38, %v3781_v39 }
0x16b1   :  { %v3791_v42 = vadd.f32 %v4045_v40, %v3786_v41 }
0x16b3   :  { %4460 = vmatmul.mubr.msk.f32.vlgmr.msra.gmra.mrb[44].mxu0 %vm155_vm1, %v3791_v42 }
0x16b4   :  { %4466 = vmatprep.mubr.msk.f32.mxu0 %vm4766_vm2, %v4763_v21  ;;  %4561 = vmatpush3.bf16.msra.mxu0 %v4560_v45 }
0x1786   :  { %v3865_v46 = vpop.f32.mrb[44].mxu0 }
0x1787   :  { %v3869_v47 = vmax.f32 %v3865_v46, 0.0  ;;  %v4461_v48 = vpop.f32.mrb[45].mxu0 }
0x1789   :  { %4467 = vmatmul.mubr.msk.f32.vlgmr.msra.gmra.mrb[46].mxu0 %vm62_vm0, %v3869_v47 }
0x185c   :  { %v3941_v49 = vpop.f32.mrb[46].mxu0 }
0x185d   :  { %3945 = vst [vmem:[#allocation9] sm:$0x3] %v3941_v49  ;;  %v4468_v50 = vpop.f32.mrb[47].mxu0 }
0x185e   :  { %4739 = shalt.err (!%p4736_p0)
}
0x185f   :  { %s4740_s7 = scalar_lea.hbm %s5272_s3, 32 }
0x1860   :  { %p4741_p1 = scmp.ne.s32.totalorder %s5272_s3, %s4740_s7  ;;  %p4744_p2 = scmp.lt.u32.totalorder %s4740_s7, %s5272_s3 }
0x1862   :  { %p4746_p3 = pnand %p4744_p2, %p4741_p1 }
0x1864   :  { %4749 = shalt.err (!%p4746_p3)
}
0x1865   :  { %3955 = dma.vmem_to_hbm [thread:$0]  %s3953_s30, 32, %s5272_s3, [#allocation5]  }
0x1866   :  { %4754 = dma.done.wait [#allocation5], 32  }
0x1867   :  { %4755 = vsyncadd [#allocation5], 4294967264 }
0x1868   :  { %3959 = vsyncpa [#allocation4], 1 }
0x1869   :  { %3960 = vsyncpa [#allocation7], 1 }
0x186a   :  { %3961 = vsyncpa [#allocation5], 1 }

</bundles_post_ra>
